<compile_context>
chip_gen: v7x
topology: tpu7x:2x2x1
jax: 0.10.0
libtpu: 0.0.40
codegen_flags: <defaults>
</compile_context>

<pallas_src>
import jax
import jax.numpy as jnp
from jax.experimental import pallas as pl
from jax.experimental.pallas import tpu as pltpu

T_DIM = 25
CODE_DIM = 128
Z_CONCAT_DIM = 32
LANE = 128          # padded feature width (== code_dim) for lane-dense vregs
BN_EPS = 1e-5


def _make_kernel(n_rows, batch):
    """Build the fused kernel closure for static (N = batch*t_dim, batch)."""
    inv_n = 1.0 / float(n_rows)
    inv_b = 1.0 / float(batch)

    def bn_relu(h, gamma, beta, inv_count):
        # Training-mode BN folded to a single scale/shift, one-pass stats.
        s1 = jnp.sum(h, axis=0, keepdims=True)
        s2 = jnp.sum(h * h, axis=0, keepdims=True)
        mean = s1 * inv_count
        var = jnp.maximum(s2 * inv_count - mean * mean, 0.0)
        scale = gamma * jax.lax.rsqrt(var + BN_EPS)
        shift = beta - mean * scale
        return jnp.maximum(h * scale + shift, 0.0)

    def kernel(x_ref, w_ref, w3_ref, bn_ref, out_ref, h2_ref):
        # fc0 -> bn0 -> relu -> fc1 -> bn1 -> relu -> fc2 -> bn2 -> relu
        x = x_ref[...]                                          # (N, 128), t-major rows
        h = jnp.dot(x, w_ref[0], preferred_element_type=jnp.float32)
        h = bn_relu(h, bn_ref[0:1, :], bn_ref[1:2, :], inv_n)
        h = jnp.dot(h, w_ref[1], preferred_element_type=jnp.float32)
        h = bn_relu(h, bn_ref[2:3, :], bn_ref[3:4, :], inv_n)
        h = jnp.dot(h, w_ref[2], preferred_element_type=jnp.float32)
        h2_ref[...] = bn_relu(h, bn_ref[4:5, :], bn_ref[5:6, :], inv_n)

        # fc3: out[b] = sum_t h2[row t*B + b, :32] @ w3[t]
        # (== PyTorch reshape(-1, t_dim*z_concat_dim) followed by nn.Linear).
        acc = jnp.zeros((batch, LANE), jnp.float32)
        for t in range(T_DIM):                                  # static 25-step unroll
            slab = h2_ref[t * batch:(t + 1) * batch, 0:Z_CONCAT_DIM]   # (B, 32)
            acc = acc + jnp.dot(slab, w3_ref[t], preferred_element_type=jnp.float32)

        # bn3 -> relu (stats over the B batch rows)
        out_ref[...] = bn_relu(acc, bn_ref[6:7, :], bn_ref[7:8, :], inv_b)

    return kernel


def init_params(key):
    """PyTorch-Linear-style uniform init, weights stored transposed (in, out)
    so the kernel computes x @ Wt directly.  The nn.Linear biases are omitted:
    under training-mode BatchNorm1d a per-feature constant added before the
    norm cancels exactly in (h - mean), so they cannot affect the output."""
    def linear_wt(k, fan_in, fan_out):
        bound = 1.0 / (fan_in ** 0.5)
        return jax.random.uniform(k, (fan_in, fan_out), jnp.float32, -bound, bound)

    k0, k1, k2, k3 = jax.random.split(key, 4)
    return {
        "w0t": linear_wt(k0, CODE_DIM, CODE_DIM),
        "w1t": linear_wt(k1, CODE_DIM, Z_CONCAT_DIM),
        "w2t": linear_wt(k2, Z_CONCAT_DIM, Z_CONCAT_DIM),
        "w3t": linear_wt(k3, Z_CONCAT_DIM * T_DIM, Z_CONCAT_DIM),
        # BatchNorm1d affine params (PyTorch default init: weight=1, bias=0)
        "g0": jnp.ones((CODE_DIM,), jnp.float32), "be0": jnp.zeros((CODE_DIM,), jnp.float32),
        "g1": jnp.ones((Z_CONCAT_DIM,), jnp.float32), "be1": jnp.zeros((Z_CONCAT_DIM,), jnp.float32),
        "g2": jnp.ones((Z_CONCAT_DIM,), jnp.float32), "be2": jnp.zeros((Z_CONCAT_DIM,), jnp.float32),
        "g3": jnp.ones((Z_CONCAT_DIM,), jnp.float32), "be3": jnp.zeros((Z_CONCAT_DIM,), jnp.float32),
    }


def pack_params(p):
    """Zero-pad the 32-wide dims to 128 lanes and collapse everything into 3
    arrays (one DMA each).  Padded weight rows/cols are zero, so padded lanes
    of every activation stay exactly 0 through the whole pipeline."""
    w1p = jnp.zeros((CODE_DIM, LANE), jnp.float32).at[:, :Z_CONCAT_DIM].set(p["w1t"])
    w2p = jnp.zeros((LANE, LANE), jnp.float32).at[:Z_CONCAT_DIM, :Z_CONCAT_DIM].set(p["w2t"])
    w_pack = jnp.stack([p["w0t"], w1p, w2p])                         # (3, 128, 128)

    w3_3d = p["w3t"].reshape(T_DIM, Z_CONCAT_DIM, Z_CONCAT_DIM)       # (T, 32, 32)
    w3_pack = jnp.zeros((T_DIM, Z_CONCAT_DIM, LANE), jnp.float32)
    w3_pack = w3_pack.at[:, :, :Z_CONCAT_DIM].set(w3_3d)              # (T, 32, 128)

    def pad_row(v):
        return jnp.zeros((LANE,), jnp.float32).at[: v.shape[0]].set(v)

    bn_pack = jnp.stack([
        pad_row(p["g0"]), pad_row(p["be0"]),
        pad_row(p["g1"]), pad_row(p["be1"]),
        pad_row(p["g2"]), pad_row(p["be2"]),
        pad_row(p["g3"]), pad_row(p["be3"]),
    ])                                                               # (8, 128)
    return {"w": w_pack, "w3": w3_pack, "bn": bn_pack}


def latent_space_mlp_concat(x, packed):
    """x: (N, code_dim) with N = batch * t_dim, rows ordered batch-major /
    t-fast (PyTorch convention).  Returns (batch, z_concat_dim)."""
    n, c = x.shape
    assert c == CODE_DIM and n % T_DIM == 0
    b = n // T_DIM

    # b-major -> t-major so each t's batch rows are contiguous for the fc3 loop.
    x_tm = x.reshape(b, T_DIM, c).transpose(1, 0, 2).reshape(n, c)

    vmem = pl.BlockSpec(memory_space=pltpu.MemorySpace.VMEM)
    out = pl.pallas_call(
        _make_kernel(n, b),
        out_shape=jax.ShapeDtypeStruct((b, LANE), jnp.float32),
        in_specs=[vmem] * 4,
        out_specs=vmem,
        scratch_shapes=[pltpu.VMEM((n, LANE), jnp.float32)],
        compiler_params=pltpu.CompilerParams(vmem_limit_bytes=32 * 1024 * 1024),
    )(x_tm, packed["w"], packed["w3"], packed["bn"])

    # TODO(synk): for large N, switch to a row-tiled grid with two-pass BN
    # stats (pl.when init/finalize); this single-block design assumes the
    # activations (~1.3 KB/row f32) fit in VMEM.
    return out[:, :Z_CONCAT_DIM]


if __name__ == "__main__":
    key = jax.random.PRNGKey(0)
    kx, kp = jax.random.split(key)

    batch = 4
    n = batch * T_DIM                       # 100 latent-code rows
    x = jax.random.normal(kx, (n, CODE_DIM), jnp.float32)

    packed = pack_params(init_params(kp))

    out = jax.jit(latent_space_mlp_concat)(x, packed)
    out = jax.block_until_ready(out)

    assert out.shape == (batch, Z_CONCAT_DIM)
    assert bool(jnp.all(jnp.isfinite(out)))
    print("KERNEL_OK")
</pallas_src>

<mosaic_0001>
module attributes {stable_mosaic.version = 11 : i64} {
  func.func @kernel(%arg0: memref<100x128xf32, #tpu.memory_space<vmem>>, %arg1: memref<3x128x128xf32, #tpu.memory_space<vmem>>, %arg2: memref<25x32x128xf32, #tpu.memory_space<vmem>>, %arg3: memref<8x128xf32, #tpu.memory_space<vmem>>, %arg4: memref<4x128xf32, #tpu.memory_space<vmem>>, %arg5: memref<100x128xf32, #tpu.memory_space<vmem>>) attributes {dimension_semantics = [], scalar_prefetch = 0 : i64, scratch_operands = 1 : i64, tpu.core_type = #tpu.core_type<tc>} {
    %c0 = arith.constant 0 : index
    %c0_0 = arith.constant 0 : index
    %0 = vector.load %arg0[%c0, %c0_0] : memref<100x128xf32, #tpu.memory_space<vmem>>, vector<100x128xf32>
    %c0_1 = arith.constant 0 : index
    %c0_2 = arith.constant 0 : index
    %c0_3 = arith.constant 0 : index
    %1 = vector.load %arg1[%c0_1, %c0_2, %c0_3] : memref<3x128x128xf32, #tpu.memory_space<vmem>>, vector<1x128x128xf32>
    %2 = vector.shape_cast %1 : vector<1x128x128xf32> to vector<128x128xf32>
    %cst = arith.constant dense<0.000000e+00> : vector<100x128xf32>
    %3 = tpu.matmul %0, %2, %cst {dimension_numbers = #tpu.dot_dimension_numbers<[1], [0], [0], [1], [0, 0, 1, 1], [], []>} : vector<100x128xf32>, vector<128x128xf32>, vector<100x128xf32> -> vector<100x128xf32>
    %c0_4 = arith.constant 0 : index
    %c0_5 = arith.constant 0 : index
    %4 = vector.load %arg3[%c0_4, %c0_5] : memref<8x128xf32, #tpu.memory_space<vmem>>, vector<1x128xf32>
    %c1 = arith.constant 1 : index
    %c0_6 = arith.constant 0 : index
    %5 = vector.load %arg3[%c1, %c0_6] : memref<8x128xf32, #tpu.memory_space<vmem>>, vector<1x128xf32>
    %cst_7 = arith.constant dense<0.000000e+00> : vector<128xf32>
    %6 = vector.multi_reduction <add>, %3, %cst_7 [0] : vector<100x128xf32> to vector<128xf32>
    %7 = vector.shape_cast %6 : vector<128xf32> to vector<1x128xf32>
    %8 = arith.mulf %3, %3 : vector<100x128xf32>
    %cst_8 = arith.constant dense<0.000000e+00> : vector<128xf32>
    %9 = vector.multi_reduction <add>, %8, %cst_8 [0] : vector<100x128xf32> to vector<128xf32>
    %10 = vector.shape_cast %9 : vector<128xf32> to vector<1x128xf32>
    %cst_9 = arith.constant 0.00999999977 : f32
    %11 = vector.broadcast %cst_9 : f32 to vector<1x128xf32>
    %12 = arith.mulf %7, %11 : vector<1x128xf32>
    %cst_10 = arith.constant 0.00999999977 : f32
    %13 = vector.broadcast %cst_10 : f32 to vector<1x128xf32>
    %14 = arith.mulf %10, %13 : vector<1x128xf32>
    %15 = arith.mulf %12, %12 : vector<1x128xf32>
    %16 = arith.subf %14, %15 : vector<1x128xf32>
    %cst_11 = arith.constant 0.000000e+00 : f32
    %17 = vector.broadcast %cst_11 : f32 to vector<1x128xf32>
    %18 = arith.maximumf %16, %17 : vector<1x128xf32>
    %cst_12 = arith.constant 9.99999974E-6 : f32
    %19 = vector.broadcast %cst_12 : f32 to vector<1x128xf32>
    %20 = arith.addf %18, %19 : vector<1x128xf32>
    %21 = math.rsqrt %20 : vector<1x128xf32>
    %22 = arith.mulf %4, %21 : vector<1x128xf32>
    %23 = arith.mulf %12, %22 : vector<1x128xf32>
    %24 = arith.subf %5, %23 : vector<1x128xf32>
    %25 = vector.broadcast %22 : vector<1x128xf32> to vector<100x128xf32>
    %26 = arith.mulf %3, %25 : vector<100x128xf32>
    %27 = vector.broadcast %24 : vector<1x128xf32> to vector<100x128xf32>
    %28 = arith.addf %26, %27 : vector<100x128xf32>
    %cst_13 = arith.constant 0.000000e+00 : f32
    %29 = vector.broadcast %cst_13 : f32 to vector<100x128xf32>
    %30 = arith.maximumf %28, %29 : vector<100x128xf32>
    %c1_14 = arith.constant 1 : index
    %c0_15 = arith.constant 0 : index
    %c0_16 = arith.constant 0 : index
    %31 = vector.load %arg1[%c1_14, %c0_15, %c0_16] : memref<3x128x128xf32, #tpu.memory_space<vmem>>, vector<1x128x128xf32>
    %32 = vector.shape_cast %31 : vector<1x128x128xf32> to vector<128x128xf32>
    %cst_17 = arith.constant dense<0.000000e+00> : vector<100x128xf32>
    %33 = tpu.matmul %30, %32, %cst_17 {dimension_numbers = #tpu.dot_dimension_numbers<[1], [0], [0], [1], [0, 0, 1, 1], [], []>} : vector<100x128xf32>, vector<128x128xf32>, vector<100x128xf32> -> vector<100x128xf32>
    %c2 = arith.constant 2 : index
    %c0_18 = arith.constant 0 : index
    %34 = vector.load %arg3[%c2, %c0_18] : memref<8x128xf32, #tpu.memory_space<vmem>>, vector<1x128xf32>
    %c3 = arith.constant 3 : index
    %c0_19 = arith.constant 0 : index
    %35 = vector.load %arg3[%c3, %c0_19] : memref<8x128xf32, #tpu.memory_space<vmem>>, vector<1x128xf32>
    %cst_20 = arith.constant dense<0.000000e+00> : vector<128xf32>
    %36 = vector.multi_reduction <add>, %33, %cst_20 [0] : vector<100x128xf32> to vector<128xf32>
    %37 = vector.shape_cast %36 : vector<128xf32> to vector<1x128xf32>
    %38 = arith.mulf %33, %33 : vector<100x128xf32>
    %cst_21 = arith.constant dense<0.000000e+00> : vector<128xf32>
    %39 = vector.multi_reduction <add>, %38, %cst_21 [0] : vector<100x128xf32> to vector<128xf32>
    %40 = vector.shape_cast %39 : vector<128xf32> to vector<1x128xf32>
    %cst_22 = arith.constant 0.00999999977 : f32
    %41 = vector.broadcast %cst_22 : f32 to vector<1x128xf32>
    %42 = arith.mulf %37, %41 : vector<1x128xf32>
    %cst_23 = arith.constant 0.00999999977 : f32
    %43 = vector.broadcast %cst_23 : f32 to vector<1x128xf32>
    %44 = arith.mulf %40, %43 : vector<1x128xf32>
    %45 = arith.mulf %42, %42 : vector<1x128xf32>
    %46 = arith.subf %44, %45 : vector<1x128xf32>
    %cst_24 = arith.constant 0.000000e+00 : f32
    %47 = vector.broadcast %cst_24 : f32 to vector<1x128xf32>
    %48 = arith.maximumf %46, %47 : vector<1x128xf32>
    %cst_25 = arith.constant 9.99999974E-6 : f32
    %49 = vector.broadcast %cst_25 : f32 to vector<1x128xf32>
    %50 = arith.addf %48, %49 : vector<1x128xf32>
    %51 = math.rsqrt %50 : vector<1x128xf32>
    %52 = arith.mulf %34, %51 : vector<1x128xf32>
    %53 = arith.mulf %42, %52 : vector<1x128xf32>
    %54 = arith.subf %35, %53 : vector<1x128xf32>
    %55 = vector.broadcast %52 : vector<1x128xf32> to vector<100x128xf32>
    %56 = arith.mulf %33, %55 : vector<100x128xf32>
    %57 = vector.broadcast %54 : vector<1x128xf32> to vector<100x128xf32>
    %58 = arith.addf %56, %57 : vector<100x128xf32>
    %cst_26 = arith.constant 0.000000e+00 : f32
    %59 = vector.broadcast %cst_26 : f32 to vector<100x128xf32>
    %60 = arith.maximumf %58, %59 : vector<100x128xf32>
    %c2_27 = arith.constant 2 : index
    %c0_28 = arith.constant 0 : index
    %c0_29 = arith.constant 0 : index
    %61 = vector.load %arg1[%c2_27, %c0_28, %c0_29] : memref<3x128x128xf32, #tpu.memory_space<vmem>>, vector<1x128x128xf32>
    %62 = vector.shape_cast %61 : vector<1x128x128xf32> to vector<128x128xf32>
    %cst_30 = arith.constant dense<0.000000e+00> : vector<100x128xf32>
    %63 = tpu.matmul %60, %62, %cst_30 {dimension_numbers = #tpu.dot_dimension_numbers<[1], [0], [0], [1], [0, 0, 1, 1], [], []>} : vector<100x128xf32>, vector<128x128xf32>, vector<100x128xf32> -> vector<100x128xf32>
    %c4 = arith.constant 4 : index
    %c0_31 = arith.constant 0 : index
    %64 = vector.load %arg3[%c4, %c0_31] : memref<8x128xf32, #tpu.memory_space<vmem>>, vector<1x128xf32>
    %c5 = arith.constant 5 : index
    %c0_32 = arith.constant 0 : index
    %65 = vector.load %arg3[%c5, %c0_32] : memref<8x128xf32, #tpu.memory_space<vmem>>, vector<1x128xf32>
    %cst_33 = arith.constant dense<0.000000e+00> : vector<128xf32>
    %66 = vector.multi_reduction <add>, %63, %cst_33 [0] : vector<100x128xf32> to vector<128xf32>
    %67 = vector.shape_cast %66 : vector<128xf32> to vector<1x128xf32>
    %68 = arith.mulf %63, %63 : vector<100x128xf32>
    %cst_34 = arith.constant dense<0.000000e+00> : vector<128xf32>
    %69 = vector.multi_reduction <add>, %68, %cst_34 [0] : vector<100x128xf32> to vector<128xf32>
    %70 = vector.shape_cast %69 : vector<128xf32> to vector<1x128xf32>
    %cst_35 = arith.constant 0.00999999977 : f32
    %71 = vector.broadcast %cst_35 : f32 to vector<1x128xf32>
    %72 = arith.mulf %67, %71 : vector<1x128xf32>
    %cst_36 = arith.constant 0.00999999977 : f32
    %73 = vector.broadcast %cst_36 : f32 to vector<1x128xf32>
    %74 = arith.mulf %70, %73 : vector<1x128xf32>
    %75 = arith.mulf %72, %72 : vector<1x128xf32>
    %76 = arith.subf %74, %75 : vector<1x128xf32>
    %cst_37 = arith.constant 0.000000e+00 : f32
    %77 = vector.broadcast %cst_37 : f32 to vector<1x128xf32>
    %78 = arith.maximumf %76, %77 : vector<1x128xf32>
    %cst_38 = arith.constant 9.99999974E-6 : f32
    %79 = vector.broadcast %cst_38 : f32 to vector<1x128xf32>
    %80 = arith.addf %78, %79 : vector<1x128xf32>
    %81 = math.rsqrt %80 : vector<1x128xf32>
    %82 = arith.mulf %64, %81 : vector<1x128xf32>
    %83 = arith.mulf %72, %82 : vector<1x128xf32>
    %84 = arith.subf %65, %83 : vector<1x128xf32>
    %85 = vector.broadcast %82 : vector<1x128xf32> to vector<100x128xf32>
    %86 = arith.mulf %63, %85 : vector<100x128xf32>
    %87 = vector.broadcast %84 : vector<1x128xf32> to vector<100x128xf32>
    %88 = arith.addf %86, %87 : vector<100x128xf32>
    %cst_39 = arith.constant 0.000000e+00 : f32
    %89 = vector.broadcast %cst_39 : f32 to vector<100x128xf32>
    %90 = arith.maximumf %88, %89 : vector<100x128xf32>
    %c0_40 = arith.constant 0 : index
    %c0_41 = arith.constant 0 : index
    %91 = vector.load %arg5[%c0_40, %c0_41] : memref<100x128xf32, #tpu.memory_space<vmem>>, vector<100x128xf32>
    tpu.vector_store %arg5[%c0_40, %c0_41], %90 {strides = array<i32>} : memref<100x128xf32, #tpu.memory_space<vmem>>, vector<100x128xf32>,
    %cst_42 = arith.constant 0.000000e+00 : f32
    %92 = vector.broadcast %cst_42 : f32 to vector<4x128xf32>
    %c0_43 = arith.constant 0 : index
    %c0_44 = arith.constant 0 : index
    %93 = vector.load %arg5[%c0_43, %c0_44] : memref<100x128xf32, #tpu.memory_space<vmem>>, vector<4x32xf32>
    %c0_45 = arith.constant 0 : index
    %c0_46 = arith.constant 0 : index
    %c0_47 = arith.constant 0 : index
    %94 = vector.load %arg2[%c0_45, %c0_46, %c0_47] : memref<25x32x128xf32, #tpu.memory_space<vmem>>, vector<1x32x128xf32>
    %95 = vector.shape_cast %94 : vector<1x32x128xf32> to vector<32x128xf32>
    %cst_48 = arith.constant dense<0.000000e+00> : vector<4x128xf32>
    %96 = tpu.matmul %93, %95, %cst_48 {dimension_numbers = #tpu.dot_dimension_numbers<[1], [0], [0], [1], [0, 0, 1, 1], [], []>} : vector<4x32xf32>, vector<32x128xf32>, vector<4x128xf32> -> vector<4x128xf32>
    %97 = arith.addf %92, %96 : vector<4x128xf32>
    %c4_49 = arith.constant 4 : index
    %c0_50 = arith.constant 0 : index
    %98 = vector.load %arg5[%c4_49, %c0_50] : memref<100x128xf32, #tpu.memory_space<vmem>>, vector<4x32xf32>
    %c1_51 = arith.constant 1 : index
    %c0_52 = arith.constant 0 : index
    %c0_53 = arith.constant 0 : index
    %99 = vector.load %arg2[%c1_51, %c0_52, %c0_53] : memref<25x32x128xf32, #tpu.memory_space<vmem>>, vector<1x32x128xf32>
    %100 = vector.shape_cast %99 : vector<1x32x128xf32> to vector<32x128xf32>
    %cst_54 = arith.constant dense<0.000000e+00> : vector<4x128xf32>
    %101 = tpu.matmul %98, %100, %cst_54 {dimension_numbers = #tpu.dot_dimension_numbers<[1], [0], [0], [1], [0, 0, 1, 1], [], []>} : vector<4x32xf32>, vector<32x128xf32>, vector<4x128xf32> -> vector<4x128xf32>
    %102 = arith.addf %97, %101 : vector<4x128xf32>
    %c8 = arith.constant 8 : index
    %c0_55 = arith.constant 0 : index
    %103 = vector.load %arg5[%c8, %c0_55] : memref<100x128xf32, #tpu.memory_space<vmem>>, vector<4x32xf32>
    %c2_56 = arith.constant 2 : index
    %c0_57 = arith.constant 0 : index
    %c0_58 = arith.constant 0 : index
    %104 = vector.load %arg2[%c2_56, %c0_57, %c0_58] : memref<25x32x128xf32, #tpu.memory_space<vmem>>, vector<1x32x128xf32>
    %105 = vector.shape_cast %104 : vector<1x32x128xf32> to vector<32x128xf32>
    %cst_59 = arith.constant dense<0.000000e+00> : vector<4x128xf32>
    %106 = tpu.matmul %103, %105, %cst_59 {dimension_numbers = #tpu.dot_dimension_numbers<[1], [0], [0], [1], [0, 0, 1, 1], [], []>} : vector<4x32xf32>, vector<32x128xf32>, vector<4x128xf32> -> vector<4x128xf32>
    %107 = arith.addf %102, %106 : vector<4x128xf32>
    %c12 = arith.constant 12 : index
    %c0_60 = arith.constant 0 : index
    %108 = vector.load %arg5[%c12, %c0_60] : memref<100x128xf32, #tpu.memory_space<vmem>>, vector<4x32xf32>
    %c3_61 = arith.constant 3 : index
    %c0_62 = arith.constant 0 : index
    %c0_63 = arith.constant 0 : index
    %109 = vector.load %arg2[%c3_61, %c0_62, %c0_63] : memref<25x32x128xf32, #tpu.memory_space<vmem>>, vector<1x32x128xf32>
    %110 = vector.shape_cast %109 : vector<1x32x128xf32> to vector<32x128xf32>
    %cst_64 = arith.constant dense<0.000000e+00> : vector<4x128xf32>
    %111 = tpu.matmul %108, %110, %cst_64 {dimension_numbers = #tpu.dot_dimension_numbers<[1], [0], [0], [1], [0, 0, 1, 1], [], []>} : vector<4x32xf32>, vector<32x128xf32>, vector<4x128xf32> -> vector<4x128xf32>
    %112 = arith.addf %107, %111 : vector<4x128xf32>
    %c16 = arith.constant 16 : index
    %c0_65 = arith.constant 0 : index
    %113 = vector.load %arg5[%c16, %c0_65] : memref<100x128xf32, #tpu.memory_space<vmem>>, vector<4x32xf32>
    %c4_66 = arith.constant 4 : index
    %c0_67 = arith.constant 0 : index
    %c0_68 = arith.constant 0 : index
    %114 = vector.load %arg2[%c4_66, %c0_67, %c0_68] : memref<25x32x128xf32, #tpu.memory_space<vmem>>, vector<1x32x128xf32>
    %115 = vector.shape_cast %114 : vector<1x32x128xf32> to vector<32x128xf32>
    %cst_69 = arith.constant dense<0.000000e+00> : vector<4x128xf32>
    %116 = tpu.matmul %113, %115, %cst_69 {dimension_numbers = #tpu.dot_dimension_numbers<[1], [0], [0], [1], [0, 0, 1, 1], [], []>} : vector<4x32xf32>, vector<32x128xf32>, vector<4x128xf32> -> vector<4x128xf32>
    %117 = arith.addf %112, %116 : vector<4x128xf32>
    %c20 = arith.constant 20 : index
    %c0_70 = arith.constant 0 : index
    %118 = vector.load %arg5[%c20, %c0_70] : memref<100x128xf32, #tpu.memory_space<vmem>>, vector<4x32xf32>
    %c5_71 = arith.constant 5 : index
    %c0_72 = arith.constant 0 : index
    %c0_73 = arith.constant 0 : index
    %119 = vector.load %arg2[%c5_71, %c0_72, %c0_73] : memref<25x32x128xf32, #tpu.memory_space<vmem>>, vector<1x32x128xf32>
    %120 = vector.shape_cast %119 : vector<1x32x128xf32> to vector<32x128xf32>
    %cst_74 = arith.constant dense<0.000000e+00> : vector<4x128xf32>
    %121 = tpu.matmul %118, %120, %cst_74 {dimension_numbers = #tpu.dot_dimension_numbers<[1], [0], [0], [1], [0, 0, 1, 1], [], []>} : vector<4x32xf32>, vector<32x128xf32>, vector<4x128xf32> -> vector<4x128xf32>
    %122 = arith.addf %117, %121 : vector<4x128xf32>
    %c24 = arith.constant 24 : index
    %c0_75 = arith.constant 0 : index
    %123 = vector.load %arg5[%c24, %c0_75] : memref<100x128xf32, #tpu.memory_space<vmem>>, vector<4x32xf32>
    %c6 = arith.constant 6 : index
    %c0_76 = arith.constant 0 : index
    %c0_77 = arith.constant 0 : index
    %124 = vector.load %arg2[%c6, %c0_76, %c0_77] : memref<25x32x128xf32, #tpu.memory_space<vmem>>, vector<1x32x128xf32>
    %125 = vector.shape_cast %124 : vector<1x32x128xf32> to vector<32x128xf32>
    %cst_78 = arith.constant dense<0.000000e+00> : vector<4x128xf32>
    %126 = tpu.matmul %123, %125, %cst_78 {dimension_numbers = #tpu.dot_dimension_numbers<[1], [0], [0], [1], [0, 0, 1, 1], [], []>} : vector<4x32xf32>, vector<32x128xf32>, vector<4x128xf32> -> vector<4x128xf32>
    %127 = arith.addf %122, %126 : vector<4x128xf32>
    %c28 = arith.constant 28 : index
    %c0_79 = arith.constant 0 : index
    %128 = vector.load %arg5[%c28, %c0_79] : memref<100x128xf32, #tpu.memory_space<vmem>>, vector<4x32xf32>
    %c7 = arith.constant 7 : index
    %c0_80 = arith.constant 0 : index
    %c0_81 = arith.constant 0 : index
    %129 = vector.load %arg2[%c7, %c0_80, %c0_81] : memref<25x32x128xf32, #tpu.memory_space<vmem>>, vector<1x32x128xf32>
    %130 = vector.shape_cast %129 : vector<1x32x128xf32> to vector<32x128xf32>
    %cst_82 = arith.constant dense<0.000000e+00> : vector<4x128xf32>
    %131 = tpu.matmul %128, %130, %cst_82 {dimension_numbers = #tpu.dot_dimension_numbers<[1], [0], [0], [1], [0, 0, 1, 1], [], []>} : vector<4x32xf32>, vector<32x128xf32>, vector<4x128xf32> -> vector<4x128xf32>
    %132 = arith.addf %127, %131 : vector<4x128xf32>
    %c32 = arith.constant 32 : index
    %c0_83 = arith.constant 0 : index
    %133 = vector.load %arg5[%c32, %c0_83] : memref<100x128xf32, #tpu.memory_space<vmem>>, vector<4x32xf32>
    %c8_84 = arith.constant 8 : index
    %c0_85 = arith.constant 0 : index
    %c0_86 = arith.constant 0 : index
    %134 = vector.load %arg2[%c8_84, %c0_85, %c0_86] : memref<25x32x128xf32, #tpu.memory_space<vmem>>, vector<1x32x128xf32>
    %135 = vector.shape_cast %134 : vector<1x32x128xf32> to vector<32x128xf32>
    %cst_87 = arith.constant dense<0.000000e+00> : vector<4x128xf32>
    %136 = tpu.matmul %133, %135, %cst_87 {dimension_numbers = #tpu.dot_dimension_numbers<[1], [0], [0], [1], [0, 0, 1, 1], [], []>} : vector<4x32xf32>, vector<32x128xf32>, vector<4x128xf32> -> vector<4x128xf32>
    %137 = arith.addf %132, %136 : vector<4x128xf32>
    %c36 = arith.constant 36 : index
    %c0_88 = arith.constant 0 : index
    %138 = vector.load %arg5[%c36, %c0_88] : memref<100x128xf32, #tpu.memory_space<vmem>>, vector<4x32xf32>
    %c9 = arith.constant 9 : index
    %c0_89 = arith.constant 0 : index
    %c0_90 = arith.constant 0 : index
    %139 = vector.load %arg2[%c9, %c0_89, %c0_90] : memref<25x32x128xf32, #tpu.memory_space<vmem>>, vector<1x32x128xf32>
    %140 = vector.shape_cast %139 : vector<1x32x128xf32> to vector<32x128xf32>
    %cst_91 = arith.constant dense<0.000000e+00> : vector<4x128xf32>
    %141 = tpu.matmul %138, %140, %cst_91 {dimension_numbers = #tpu.dot_dimension_numbers<[1], [0], [0], [1], [0, 0, 1, 1], [], []>} : vector<4x32xf32>, vector<32x128xf32>, vector<4x128xf32> -> vector<4x128xf32>
    %142 = arith.addf %137, %141 : vector<4x128xf32>
    %c40 = arith.constant 40 : index
    %c0_92 = arith.constant 0 : index
    %143 = vector.load %arg5[%c40, %c0_92] : memref<100x128xf32, #tpu.memory_space<vmem>>, vector<4x32xf32>
    %c10 = arith.constant 10 : index
    %c0_93 = arith.constant 0 : index
    %c0_94 = arith.constant 0 : index
    %144 = vector.load %arg2[%c10, %c0_93, %c0_94] : memref<25x32x128xf32, #tpu.memory_space<vmem>>, vector<1x32x128xf32>
    %145 = vector.shape_cast %144 : vector<1x32x128xf32> to vector<32x128xf32>
    %cst_95 = arith.constant dense<0.000000e+00> : vector<4x128xf32>
    %146 = tpu.matmul %143, %145, %cst_95 {dimension_numbers = #tpu.dot_dimension_numbers<[1], [0], [0], [1], [0, 0, 1, 1], [], []>} : vector<4x32xf32>, vector<32x128xf32>, vector<4x128xf32> -> vector<4x128xf32>
    %147 = arith.addf %142, %146 : vector<4x128xf32>
    %c44 = arith.constant 44 : index
    %c0_96 = arith.constant 0 : index
    %148 = vector.load %arg5[%c44, %c0_96] : memref<100x128xf32, #tpu.memory_space<vmem>>, vector<4x32xf32>
    %c11 = arith.constant 11 : index
    %c0_97 = arith.constant 0 : index
    %c0_98 = arith.constant 0 : index
    %149 = vector.load %arg2[%c11, %c0_97, %c0_98] : memref<25x32x128xf32, #tpu.memory_space<vmem>>, vector<1x32x128xf32>
    %150 = vector.shape_cast %149 : vector<1x32x128xf32> to vector<32x128xf32>
    %cst_99 = arith.constant dense<0.000000e+00> : vector<4x128xf32>
    %151 = tpu.matmul %148, %150, %cst_99 {dimension_numbers = #tpu.dot_dimension_numbers<[1], [0], [0], [1], [0, 0, 1, 1], [], []>} : vector<4x32xf32>, vector<32x128xf32>, vector<4x128xf32> -> vector<4x128xf32>
    %152 = arith.addf %147, %151 : vector<4x128xf32>
    %c48 = arith.constant 48 : index
    %c0_100 = arith.constant 0 : index
    %153 = vector.load %arg5[%c48, %c0_100] : memref<100x128xf32, #tpu.memory_space<vmem>>, vector<4x32xf32>
    %c12_101 = arith.constant 12 : index
    %c0_102 = arith.constant 0 : index
    %c0_103 = arith.constant 0 : index
    %154 = vector.load %arg2[%c12_101, %c0_102, %c0_103] : memref<25x32x128xf32, #tpu.memory_space<vmem>>, vector<1x32x128xf32>
    %155 = vector.shape_cast %154 : vector<1x32x128xf32> to vector<32x128xf32>
    %cst_104 = arith.constant dense<0.000000e+00> : vector<4x128xf32>
    %156 = tpu.matmul %153, %155, %cst_104 {dimension_numbers = #tpu.dot_dimension_numbers<[1], [0], [0], [1], [0, 0, 1, 1], [], []>} : vector<4x32xf32>, vector<32x128xf32>, vector<4x128xf32> -> vector<4x128xf32>
    %157 = arith.addf %152, %156 : vector<4x128xf32>
    %c52 = arith.constant 52 : index
    %c0_105 = arith.constant 0 : index
    %158 = vector.load %arg5[%c52, %c0_105] : memref<100x128xf32, #tpu.memory_space<vmem>>, vector<4x32xf32>
    %c13 = arith.constant 13 : index
    %c0_106 = arith.constant 0 : index
    %c0_107 = arith.constant 0 : index
    %159 = vector.load %arg2[%c13, %c0_106, %c0_107] : memref<25x32x128xf32, #tpu.memory_space<vmem>>, vector<1x32x128xf32>
    %160 = vector.shape_cast %159 : vector<1x32x128xf32> to vector<32x128xf32>
    %cst_108 = arith.constant dense<0.000000e+00> : vector<4x128xf32>
    %161 = tpu.matmul %158, %160, %cst_108 {dimension_numbers = #tpu.dot_dimension_numbers<[1], [0], [0], [1], [0, 0, 1, 1], [], []>} : vector<4x32xf32>, vector<32x128xf32>, vector<4x128xf32> -> vector<4x128xf32>
    %162 = arith.addf %157, %161 : vector<4x128xf32>
    %c56 = arith.constant 56 : index
    %c0_109 = arith.constant 0 : index
    %163 = vector.load %arg5[%c56, %c0_109] : memref<100x128xf32, #tpu.memory_space<vmem>>, vector<4x32xf32>
    %c14 = arith.constant 14 : index
    %c0_110 = arith.constant 0 : index
    %c0_111 = arith.constant 0 : index
    %164 = vector.load %arg2[%c14, %c0_110, %c0_111] : memref<25x32x128xf32, #tpu.memory_space<vmem>>, vector<1x32x128xf32>
    %165 = vector.shape_cast %164 : vector<1x32x128xf32> to vector<32x128xf32>
    %cst_112 = arith.constant dense<0.000000e+00> : vector<4x128xf32>
    %166 = tpu.matmul %163, %165, %cst_112 {dimension_numbers = #tpu.dot_dimension_numbers<[1], [0], [0], [1], [0, 0, 1, 1], [], []>} : vector<4x32xf32>, vector<32x128xf32>, vector<4x128xf32> -> vector<4x128xf32>
    %167 = arith.addf %162, %166 : vector<4x128xf32>
    %c60 = arith.constant 60 : index
    %c0_113 = arith.constant 0 : index
    %168 = vector.load %arg5[%c60, %c0_113] : memref<100x128xf32, #tpu.memory_space<vmem>>, vector<4x32xf32>
    %c15 = arith.constant 15 : index
    %c0_114 = arith.constant 0 : index
    %c0_115 = arith.constant 0 : index
    %169 = vector.load %arg2[%c15, %c0_114, %c0_115] : memref<25x32x128xf32, #tpu.memory_space<vmem>>, vector<1x32x128xf32>
    %170 = vector.shape_cast %169 : vector<1x32x128xf32> to vector<32x128xf32>
    %cst_116 = arith.constant dense<0.000000e+00> : vector<4x128xf32>
    %171 = tpu.matmul %168, %170, %cst_116 {dimension_numbers = #tpu.dot_dimension_numbers<[1], [0], [0], [1], [0, 0, 1, 1], [], []>} : vector<4x32xf32>, vector<32x128xf32>, vector<4x128xf32> -> vector<4x128xf32>
    %172 = arith.addf %167, %171 : vector<4x128xf32>
    %c64 = arith.constant 64 : index
    %c0_117 = arith.constant 0 : index
    %173 = vector.load %arg5[%c64, %c0_117] : memref<100x128xf32, #tpu.memory_space<vmem>>, vector<4x32xf32>
    %c16_118 = arith.constant 16 : index
    %c0_119 = arith.constant 0 : index
    %c0_120 = arith.constant 0 : index
    %174 = vector.load %arg2[%c16_118, %c0_119, %c0_120] : memref<25x32x128xf32, #tpu.memory_space<vmem>>, vector<1x32x128xf32>
    %175 = vector.shape_cast %174 : vector<1x32x128xf32> to vector<32x128xf32>
    %cst_121 = arith.constant dense<0.000000e+00> : vector<4x128xf32>
    %176 = tpu.matmul %173, %175, %cst_121 {dimension_numbers = #tpu.dot_dimension_numbers<[1], [0], [0], [1], [0, 0, 1, 1], [], []>} : vector<4x32xf32>, vector<32x128xf32>, vector<4x128xf32> -> vector<4x128xf32>
    %177 = arith.addf %172, %176 : vector<4x128xf32>
    %c68 = arith.constant 68 : index
    %c0_122 = arith.constant 0 : index
    %178 = vector.load %arg5[%c68, %c0_122] : memref<100x128xf32, #tpu.memory_space<vmem>>, vector<4x32xf32>
    %c17 = arith.constant 17 : index
    %c0_123 = arith.constant 0 : index
    %c0_124 = arith.constant 0 : index
    %179 = vector.load %arg2[%c17, %c0_123, %c0_124] : memref<25x32x128xf32, #tpu.memory_space<vmem>>, vector<1x32x128xf32>
    %180 = vector.shape_cast %179 : vector<1x32x128xf32> to vector<32x128xf32>
    %cst_125 = arith.constant dense<0.000000e+00> : vector<4x128xf32>
    %181 = tpu.matmul %178, %180, %cst_125 {dimension_numbers = #tpu.dot_dimension_numbers<[1], [0], [0], [1], [0, 0, 1, 1], [], []>} : vector<4x32xf32>, vector<32x128xf32>, vector<4x128xf32> -> vector<4x128xf32>
    %182 = arith.addf %177, %181 : vector<4x128xf32>
    %c72 = arith.constant 72 : index
    %c0_126 = arith.constant 0 : index
    %183 = vector.load %arg5[%c72, %c0_126] : memref<100x128xf32, #tpu.memory_space<vmem>>, vector<4x32xf32>
    %c18 = arith.constant 18 : index
    %c0_127 = arith.constant 0 : index
    %c0_128 = arith.constant 0 : index
    %184 = vector.load %arg2[%c18, %c0_127, %c0_128] : memref<25x32x128xf32, #tpu.memory_space<vmem>>, vector<1x32x128xf32>
    %185 = vector.shape_cast %184 : vector<1x32x128xf32> to vector<32x128xf32>
    %cst_129 = arith.constant dense<0.000000e+00> : vector<4x128xf32>
    %186 = tpu.matmul %183, %185, %cst_129 {dimension_numbers = #tpu.dot_dimension_numbers<[1], [0], [0], [1], [0, 0, 1, 1], [], []>} : vector<4x32xf32>, vector<32x128xf32>, vector<4x128xf32> -> vector<4x128xf32>
    %187 = arith.addf %182, %186 : vector<4x128xf32>
    %c76 = arith.constant 76 : index
    %c0_130 = arith.constant 0 : index
    %188 = vector.load %arg5[%c76, %c0_130] : memref<100x128xf32, #tpu.memory_space<vmem>>, vector<4x32xf32>
    %c19 = arith.constant 19 : index
    %c0_131 = arith.constant 0 : index
    %c0_132 = arith.constant 0 : index
    %189 = vector.load %arg2[%c19, %c0_131, %c0_132] : memref<25x32x128xf32, #tpu.memory_space<vmem>>, vector<1x32x128xf32>
    %190 = vector.shape_cast %189 : vector<1x32x128xf32> to vector<32x128xf32>
    %cst_133 = arith.constant dense<0.000000e+00> : vector<4x128xf32>
    %191 = tpu.matmul %188, %190, %cst_133 {dimension_numbers = #tpu.dot_dimension_numbers<[1], [0], [0], [1], [0, 0, 1, 1], [], []>} : vector<4x32xf32>, vector<32x128xf32>, vector<4x128xf32> -> vector<4x128xf32>
    %192 = arith.addf %187, %191 : vector<4x128xf32>
    %c80 = arith.constant 80 : index
    %c0_134 = arith.constant 0 : index
    %193 = vector.load %arg5[%c80, %c0_134] : memref<100x128xf32, #tpu.memory_space<vmem>>, vector<4x32xf32>
    %c20_135 = arith.constant 20 : index
    %c0_136 = arith.constant 0 : index
    %c0_137 = arith.constant 0 : index
    %194 = vector.load %arg2[%c20_135, %c0_136, %c0_137] : memref<25x32x128xf32, #tpu.memory_space<vmem>>, vector<1x32x128xf32>
    %195 = vector.shape_cast %194 : vector<1x32x128xf32> to vector<32x128xf32>
    %cst_138 = arith.constant dense<0.000000e+00> : vector<4x128xf32>
    %196 = tpu.matmul %193, %195, %cst_138 {dimension_numbers = #tpu.dot_dimension_numbers<[1], [0], [0], [1], [0, 0, 1, 1], [], []>} : vector<4x32xf32>, vector<32x128xf32>, vector<4x128xf32> -> vector<4x128xf32>
    %197 = arith.addf %192, %196 : vector<4x128xf32>
    %c84 = arith.constant 84 : index
    %c0_139 = arith.constant 0 : index
    %198 = vector.load %arg5[%c84, %c0_139] : memref<100x128xf32, #tpu.memory_space<vmem>>, vector<4x32xf32>
    %c21 = arith.constant 21 : index
    %c0_140 = arith.constant 0 : index
    %c0_141 = arith.constant 0 : index
    %199 = vector.load %arg2[%c21, %c0_140, %c0_141] : memref<25x32x128xf32, #tpu.memory_space<vmem>>, vector<1x32x128xf32>
    %200 = vector.shape_cast %199 : vector<1x32x128xf32> to vector<32x128xf32>
    %cst_142 = arith.constant dense<0.000000e+00> : vector<4x128xf32>
    %201 = tpu.matmul %198, %200, %cst_142 {dimension_numbers = #tpu.dot_dimension_numbers<[1], [0], [0], [1], [0, 0, 1, 1], [], []>} : vector<4x32xf32>, vector<32x128xf32>, vector<4x128xf32> -> vector<4x128xf32>
    %202 = arith.addf %197, %201 : vector<4x128xf32>
    %c88 = arith.constant 88 : index
    %c0_143 = arith.constant 0 : index
    %203 = vector.load %arg5[%c88, %c0_143] : memref<100x128xf32, #tpu.memory_space<vmem>>, vector<4x32xf32>
    %c22 = arith.constant 22 : index
    %c0_144 = arith.constant 0 : index
    %c0_145 = arith.constant 0 : index
    %204 = vector.load %arg2[%c22, %c0_144, %c0_145] : memref<25x32x128xf32, #tpu.memory_space<vmem>>, vector<1x32x128xf32>
    %205 = vector.shape_cast %204 : vector<1x32x128xf32> to vector<32x128xf32>
    %cst_146 = arith.constant dense<0.000000e+00> : vector<4x128xf32>
    %206 = tpu.matmul %203, %205, %cst_146 {dimension_numbers = #tpu.dot_dimension_numbers<[1], [0], [0], [1], [0, 0, 1, 1], [], []>} : vector<4x32xf32>, vector<32x128xf32>, vector<4x128xf32> -> vector<4x128xf32>
    %207 = arith.addf %202, %206 : vector<4x128xf32>
    %c92 = arith.constant 92 : index
    %c0_147 = arith.constant 0 : index
    %208 = vector.load %arg5[%c92, %c0_147] : memref<100x128xf32, #tpu.memory_space<vmem>>, vector<4x32xf32>
    %c23 = arith.constant 23 : index
    %c0_148 = arith.constant 0 : index
    %c0_149 = arith.constant 0 : index
    %209 = vector.load %arg2[%c23, %c0_148, %c0_149] : memref<25x32x128xf32, #tpu.memory_space<vmem>>, vector<1x32x128xf32>
    %210 = vector.shape_cast %209 : vector<1x32x128xf32> to vector<32x128xf32>
    %cst_150 = arith.constant dense<0.000000e+00> : vector<4x128xf32>
    %211 = tpu.matmul %208, %210, %cst_150 {dimension_numbers = #tpu.dot_dimension_numbers<[1], [0], [0], [1], [0, 0, 1, 1], [], []>} : vector<4x32xf32>, vector<32x128xf32>, vector<4x128xf32> -> vector<4x128xf32>
    %212 = arith.addf %207, %211 : vector<4x128xf32>
    %c96 = arith.constant 96 : index
    %c0_151 = arith.constant 0 : index
    %213 = vector.load %arg5[%c96, %c0_151] : memref<100x128xf32, #tpu.memory_space<vmem>>, vector<4x32xf32>
    %c24_152 = arith.constant 24 : index
    %c0_153 = arith.constant 0 : index
    %c0_154 = arith.constant 0 : index
    %214 = vector.load %arg2[%c24_152, %c0_153, %c0_154] : memref<25x32x128xf32, #tpu.memory_space<vmem>>, vector<1x32x128xf32>
    %215 = vector.shape_cast %214 : vector<1x32x128xf32> to vector<32x128xf32>
    %cst_155 = arith.constant dense<0.000000e+00> : vector<4x128xf32>
    %216 = tpu.matmul %213, %215, %cst_155 {dimension_numbers = #tpu.dot_dimension_numbers<[1], [0], [0], [1], [0, 0, 1, 1], [], []>} : vector<4x32xf32>, vector<32x128xf32>, vector<4x128xf32> -> vector<4x128xf32>
    %217 = arith.addf %212, %216 : vector<4x128xf32>
    %c6_156 = arith.constant 6 : index
    %c0_157 = arith.constant 0 : index
    %218 = vector.load %arg3[%c6_156, %c0_157] : memref<8x128xf32, #tpu.memory_space<vmem>>, vector<1x128xf32>
    %c7_158 = arith.constant 7 : index
    %c0_159 = arith.constant 0 : index
    %219 = vector.load %arg3[%c7_158, %c0_159] : memref<8x128xf32, #tpu.memory_space<vmem>>, vector<1x128xf32>
    %cst_160 = arith.constant dense<0.000000e+00> : vector<128xf32>
    %220 = vector.multi_reduction <add>, %217, %cst_160 [0] : vector<4x128xf32> to vector<128xf32>
    %221 = vector.shape_cast %220 : vector<128xf32> to vector<1x128xf32>
    %222 = arith.mulf %217, %217 : vector<4x128xf32>
    %cst_161 = arith.constant dense<0.000000e+00> : vector<128xf32>
    %223 = vector.multi_reduction <add>, %222, %cst_161 [0] : vector<4x128xf32> to vector<128xf32>
    %224 = vector.shape_cast %223 : vector<128xf32> to vector<1x128xf32>
    %cst_162 = arith.constant 2.500000e-01 : f32
    %225 = vector.broadcast %cst_162 : f32 to vector<1x128xf32>
    %226 = arith.mulf %221, %225 : vector<1x128xf32>
    %cst_163 = arith.constant 2.500000e-01 : f32
    %227 = vector.broadcast %cst_163 : f32 to vector<1x128xf32>
    %228 = arith.mulf %224, %227 : vector<1x128xf32>
    %229 = arith.mulf %226, %226 : vector<1x128xf32>
    %230 = arith.subf %228, %229 : vector<1x128xf32>
    %cst_164 = arith.constant 0.000000e+00 : f32
    %231 = vector.broadcast %cst_164 : f32 to vector<1x128xf32>
    %232 = arith.maximumf %230, %231 : vector<1x128xf32>
    %cst_165 = arith.constant 9.99999974E-6 : f32
    %233 = vector.broadcast %cst_165 : f32 to vector<1x128xf32>
    %234 = arith.addf %232, %233 : vector<1x128xf32>
    %235 = math.rsqrt %234 : vector<1x128xf32>
    %236 = arith.mulf %218, %235 : vector<1x128xf32>
    %237 = arith.mulf %226, %236 : vector<1x128xf32>
    %238 = arith.subf %219, %237 : vector<1x128xf32>
    %239 = vector.broadcast %236 : vector<1x128xf32> to vector<4x128xf32>
    %240 = arith.mulf %217, %239 : vector<4x128xf32>
    %241 = vector.broadcast %238 : vector<1x128xf32> to vector<4x128xf32>
    %242 = arith.addf %240, %241 : vector<4x128xf32>
    %cst_166 = arith.constant 0.000000e+00 : f32
    %243 = vector.broadcast %cst_166 : f32 to vector<4x128xf32>
    %244 = arith.maximumf %242, %243 : vector<4x128xf32>
    %c0_167 = arith.constant 0 : index
    %c0_168 = arith.constant 0 : index
    %245 = vector.load %arg4[%c0_167, %c0_168] : memref<4x128xf32, #tpu.memory_space<vmem>>, vector<4x128xf32>
    tpu.vector_store %arg4[%c0_167, %c0_168], %244 {strides = array<i32>} : memref<4x128xf32, #tpu.memory_space<vmem>>, vector<4x128xf32>,
    return
  }
}

</mosaic_0001>

<bundles_post_ra>
// kernel: latent_space_mlp_concat.1
= control target key start
LH: loop header
LB: loop body
LE: loop exit
PB: predicated region body
PF: predicated region fallthrough
CT: control target
= control target key end

     0   :  { %9 = vsyncpa [#allocation4], 0  ;;  %s4652_s0 = inlined_call_operand.vmem [shape: f32[100,128], index: 0, kind: input, shape index: {}]   ;;  %s4653_s1 = inlined_call_operand.vmem [shape: f32[3,128,128], index: 1, kind: input, shape index: {}]   ;;  %s4654_s2 = inlined_call_operand.hbm [shape: f32[25,32,128], index: 2, kind: input, shape index: {}]   ;;  %s4655_s3 = inlined_call_operand.vmem [shape: f32[8,128], index: 3, kind: input, shape index: {}]   ;;  %s4656_s4 = inlined_call_operand.hbm [shape: f32[4,128], index: 4, kind: output, shape index: {}]  }
   0x1   :  { %10 = vsyncpa [#allocation5], 0  ;;  %s3970_s15 = smov [#allocation3]   ;;  %s3922_s19 = scalar_lea.hbm %s4654_s2, 12800 }
   0x2   :  { %s20_s16 = sshll.u32 %s3970_s15, 4  ;;  %p3923_p0 = scmp.ne.s32.totalorder %s4654_s2, %s3922_s19  ;;  %s21_s16 = int_to_ptr.vmem [resolvable:$true] %s20_s16 }
   0x3   :  { %p3926_p1 = scmp.lt.u32.totalorder %s3922_s19, %s4654_s2 }
   0x5   :  { %p3928_p2 = pnand %p3926_p1, %p3923_p0 }
   0x7   :  { %3931 = shalt.err (!%p3928_p2)
}
   0x8   :  { %s3932_s24 = scalar_lea.vmem %s21_s16, 12800  ;;  %p3937_p4 = scmp.lt.s32.totalorder %s21_s16, %s21_s16 }
   0x9   :  { %p3933_p3 = scmp.ne.s32.totalorder %s21_s16, %s3932_s24  ;;  %p3938_p5 = scmp.lt.s32.totalorder %s3932_s24, %s3932_s24 }
   0xb   :  { %p3939_p6 = por %p3938_p5, %p3937_p4 }
   0xd   :  { %p3940_p7 = pnand %p3939_p6, %p3933_p3 }
   0xf   :  { %3943 = shalt.err (!%p3940_p7)
}
  0x10   :  { %s3971_s25 = smov 128   ;;  %s3972_s26 = smov 8  }
  0x11   :  { %26 = dma.hbm_to_vmem [thread:$0]  %s4654_s2, 12800, %s21_s16, [#allocation4], %s3971_s25, %s3971_s25, %s3972_s26  }
  0x12   :  { %3966 = dma.done.wait [#allocation4], 12800  }
  0x13   :  { %3967 = vsyncadd [#allocation4], 4294954496  ;;  %v3973_v0 = vmov 0.0|0.0   ;;  %vm3974_vm0 = vmmov 0   ;;  %v3975_v1 = vmov 0.0   ;;  %v45_v2 = vld [vmem:[%s4653_s1] sm:$0xff] }
  0x14   :  { %3638 = vmatprep.subr.bf16.mxu0 %v3973_v0  ;;  %3182 = vmatprep.mubr.msk.f32.mxu0 %vm3974_vm0, %v3975_v1  ;;  %v46_v3 = vld [vmem:[%s4653_s1 + $0x8] sm:$0xff]  ;;  %v47_v4 = vld [vmem:[%s4653_s1 + $0x10] sm:$0xff]  ;;  %v48_v6 = vld [vmem:[%s4653_s1 + $0x18] sm:$0xff]  ;;  %vm204_vm1 = vcmask 1043456   ;;  %vm840_vm2 = vcmask 261120   ;;  %s3976_s28 = smov [#allocation6]  }
  0x15   :  { %3716 = vmatprep.subr.bf16.mxu1 %v3973_v0  ;;  %3382 = vmatprep.mubr.msk.f32.mxu1 %vm3974_vm0, %v3975_v1  ;;  %v3639_v5 = vpack.c.bf16 %v46_v3, %v45_v2  ;;  %v3642_v7 = vpack.c.bf16 %v48_v6, %v47_v4  ;;  %v49_v8 = vld [vmem:[%s4653_s1 + $0x20] sm:$0xff]  ;;  %v50_v9 = vld [vmem:[%s4653_s1 + $0x28] sm:$0xff]  ;;  %v51_v11 = vld [vmem:[%s4653_s1 + $0x30] sm:$0xff]  ;;  %s2872_s29 = sshll.u32 %s3976_s28, 4  ;;  %s2873_s29 = int_to_ptr.vmem [resolvable:$true] %s2872_s29 }
  0x16   :  { %v3645_v10 = vpack.c.bf16 %v50_v9, %v49_v8  ;;  %v52_v12 = vld [vmem:[%s4653_s1 + $0x38] sm:$0xff]  ;;  %v53_v14 = vld [vmem:[%s4653_s1 + $0x40] sm:$0xff]  ;;  %v54_v15 = vld [vmem:[%s4653_s1 + $0x48] sm:$0xff]  ;;  %s3944_s30 = scalar_lea.vmem %s2873_s29, 64  ;;  %p3949_p9 = scmp.lt.s32.totalorder %s2873_s29, %s2873_s29 }
  0x17   :  { %3640 = vmatpush3.bf16.msra.mxu0 %v3639_v5  ;;  %v3648_v13 = vpack.c.bf16 %v52_v12, %v51_v11  ;;  %v3651_v16 = vpack.c.bf16 %v54_v15, %v53_v14  ;;  %v55_v17 = vld [vmem:[%s4653_s1 + $0x50] sm:$0xff]  ;;  %v56_v18 = vld [vmem:[%s4653_s1 + $0x58] sm:$0xff]  ;;  %v57_v20 = vld [vmem:[%s4653_s1 + $0x60] sm:$0xff]  ;;  %p3945_p8 = scmp.ne.s32.totalorder %s2873_s29, %s3944_s30  ;;  %p3950_p10 = scmp.lt.s32.totalorder %s3944_s30, %s3944_s30 }
  0x18   :  { %3641 = vmatprep.subr.bf16.mxu0 %v3973_v0  ;;  %v3654_v19 = vpack.c.bf16 %v56_v18, %v55_v17  ;;  %v58_v21 = vld [vmem:[%s4653_s1 + $0x68] sm:$0xff]  ;;  %v59_v23 = vld [vmem:[%s4653_s1 + $0x70] sm:$0xff]  ;;  %v60_v24 = vld [vmem:[%s4653_s1 + $0x78] sm:$0xff] }
  0x19   :  { %v3657_v22 = vpack.c.bf16 %v58_v21, %v57_v20  ;;  %v3660_v25 = vpack.c.bf16 %v60_v24, %v59_v23  ;;  %v32_v26 = vld [vmem:[%s4652_s0] sm:$0xff]  ;;  %v33_v27 = vld [vmem:[%s4652_s0 + $0x8] sm:$0xff]  ;;  %v34_v28 = vld [vmem:[%s4652_s0 + $0x10] sm:$0xff]  ;;  %p3951_p11 = por %p3950_p10, %p3949_p9 }
  0x1a   :  { %v35_v29 = vld [vmem:[%s4652_s0 + $0x18] sm:$0xff]  ;;  %v36_v30 = vld [vmem:[%s4652_s0 + $0x20] sm:$0xff]  ;;  %v37_v31 = vld [vmem:[%s4652_s0 + $0x28] sm:$0xff] }
  0x1b   :  { %3643 = vmatpush3.bf16.msra.mxu0 %v3642_v7  ;;  %v38_v32 = vld [vmem:[%s4652_s0 + $0x30] sm:$0xff]  ;;  %v39_v33 = vld [vmem:[%s4652_s0 + $0x38] sm:$0xff]  ;;  %v40_v34 = vld [vmem:[%s4652_s0 + $0x40] sm:$0xff]  ;;  %p3952_p12 = pnand %p3951_p11, %p3945_p8 }
  0x1c   :  { %3644 = vmatprep.subr.bf16.mxu0 %v3973_v0  ;;  %v41_v35 = vld [vmem:[%s4652_s0 + $0x48] sm:$0xff]  ;;  %v42_v36 = vld [vmem:[%s4652_s0 + $0x50] sm:$0xff]  ;;  %v43_v37 = vld [vmem:[%s4652_s0 + $0x58] sm:$0xff] }
  0x1d   :  { %v44_v38 = vld [vmem:[%s4652_s0 + $0x60] sm:$0xf]  ;;  %v2882_v40 = vld [vmem:[%s4653_s1 + $0x88] sm:$0xff]  ;;  %v2883_v42 = vld [vmem:[%s4653_s1 + $0x90] sm:$0xff] }
  0x1e   :  { %v2881_v39 = vld [vmem:[%s4653_s1 + $0x80] sm:$0xff]  ;;  %v2884_v43 = vld [vmem:[%s4653_s1 + $0x98] sm:$0xff]  ;;  %v2886_v46 = vld [vmem:[%s4653_s1 + $0xa8] sm:$0xff] }
  0x1f   :  { %3646 = vmatpush3.bf16.msra.mxu0 %v3645_v10  ;;  %v3663_v41 = vpack.c.bf16 %v2882_v40, %v2881_v39  ;;  %v3666_v44 = vpack.c.bf16 %v2884_v43, %v2883_v42  ;;  %v2885_v45 = vld [vmem:[%s4653_s1 + $0xa0] sm:$0xff]  ;;  %v2887_v48 = vld [vmem:[%s4653_s1 + $0xb0] sm:$0xff]  ;;  %v2888_v49 = vld [vmem:[%s4653_s1 + $0xb8] sm:$0xff] }
  0x20   :  { %3647 = vmatprep.subr.bf16.mxu0 %v3973_v0  ;;  %v3669_v47 = vpack.c.bf16 %v2886_v46, %v2885_v45  ;;  %v3672_v50 = vpack.c.bf16 %v2888_v49, %v2887_v48  ;;  %v2889_v51 = vld [vmem:[%s4653_s1 + $0xc0] sm:$0xff]  ;;  %v2890_v52 = vld [vmem:[%s4653_s1 + $0xc8] sm:$0xff]  ;;  %v2891_v54 = vld [vmem:[%s4653_s1 + $0xd0] sm:$0xff] }
  0x21   :  { %v3675_v53 = vpack.c.bf16 %v2890_v52, %v2889_v51  ;;  %v2892_v55 = vld [vmem:[%s4653_s1 + $0xd8] sm:$0xff]  ;;  %v2893_v57 = vld [vmem:[%s4653_s1 + $0xe0] sm:$0xff]  ;;  %v2894_v58 = vld [vmem:[%s4653_s1 + $0xe8] sm:$0xff] }
  0x22   :  { %v3678_v56 = vpack.c.bf16 %v2892_v55, %v2891_v54  ;;  %v3681_v59 = vpack.c.bf16 %v2894_v58, %v2893_v57  ;;  %v2895_v60 = vld [vmem:[%s4653_s1 + $0xf0] sm:$0xff]  ;;  %v2896_v61 = vld [vmem:[%s4653_s1 + $0xf8] sm:$0xff] }
  0x23   :  { %3649 = vmatpush3.bf16.msra.mxu0 %v3648_v13  ;;  %v3684_v62 = vpack.c.bf16 %v2896_v61, %v2895_v60 }
  0x24   :  { %3650 = vmatprep.subr.bf16.mxu0 %v3973_v0 }
  0x27   :  { %3652 = vmatpush3.bf16.msra.mxu0 %v3651_v16 }
  0x28   :  { %3653 = vmatprep.subr.bf16.mxu0 %v3973_v0 }
  0x2b   :  { %3655 = vmatpush3.bf16.msra.mxu0 %v3654_v19 }
  0x2c   :  { %3656 = vmatprep.subr.bf16.mxu0 %v3973_v0 }
  0x2f   :  { %3658 = vmatpush3.bf16.msra.mxu0 %v3657_v22 }
  0x30   :  { %3659 = vmatprep.subr.bf16.mxu0 %v3973_v0 }
  0x33   :  { %3661 = vmatpush3.bf16.msra.mxu0 %v3660_v25 }
  0x34   :  { %3662 = vmatprep.subr.bf16.mxu0 %v3973_v0 }
  0x36   :  { %3183 = vmatmul.mubr.f32.vlgmr.msra.gmra.mrb[0].mxu0 %v32_v26 }
  0x37   :  { %3185 = vmatprep.mubr.msk.f32.mxu0 %vm3974_vm0, %v3975_v1  ;;  %3664 = vmatpush3.bf16.msra.mxu0 %v3663_v41 }
  0x38   :  { %3665 = vmatprep.subr.bf16.mxu0 %v3973_v0 }
  0x3a   :  { %3186 = vmatmul.mubr.f32.gmra.mrb[2].mxu0 %v33_v27 }
  0x3b   :  { %3188 = vmatprep.mubr.msk.f32.mxu0 %vm3974_vm0, %v3975_v1  ;;  %3667 = vmatpush3.bf16.msra.mxu0 %v3666_v44 }
  0x3c   :  { %3668 = vmatprep.subr.bf16.mxu0 %v3973_v0 }
  0x3e   :  { %3189 = vmatmul.mubr.f32.gmra.mrb[4].mxu0 %v34_v28 }
  0x3f   :  { %3191 = vmatprep.mubr.msk.f32.mxu0 %vm3974_vm0, %v3975_v1  ;;  %3670 = vmatpush3.bf16.msra.mxu0 %v3669_v47 }
  0x40   :  { %3671 = vmatprep.subr.bf16.mxu0 %v3973_v0 }
  0x42   :  { %3192 = vmatmul.mubr.f32.gmra.mrb[6].mxu0 %v35_v29 }
  0x43   :  { %3194 = vmatprep.mubr.msk.f32.mxu0 %vm3974_vm0, %v3975_v1  ;;  %3673 = vmatpush3.bf16.msra.mxu0 %v3672_v50 }
  0x44   :  { %3674 = vmatprep.subr.bf16.mxu0 %v3973_v0 }
  0x46   :  { %3195 = vmatmul.mubr.f32.gmra.mrb[8].mxu0 %v36_v30 }
  0x47   :  { %3197 = vmatprep.mubr.msk.f32.mxu0 %vm3974_vm0, %v3975_v1  ;;  %3676 = vmatpush3.bf16.msra.mxu0 %v3675_v53 }
  0x48   :  { %3677 = vmatprep.subr.bf16.mxu0 %v3973_v0 }
  0x4a   :  { %3198 = vmatmul.mubr.f32.gmra.mrb[10].mxu0 %v37_v31 }
  0x4b   :  { %3200 = vmatprep.mubr.msk.f32.mxu0 %vm3974_vm0, %v3975_v1  ;;  %3679 = vmatpush3.bf16.msra.mxu0 %v3678_v56 }
  0x4c   :  { %3680 = vmatprep.subr.bf16.mxu0 %v3973_v0 }
  0x4e   :  { %3201 = vmatmul.mubr.f32.gmra.mrb[12].mxu0 %v38_v32 }
  0x4f   :  { %3203 = vmatprep.mubr.msk.f32.mxu0 %vm3974_vm0, %v3975_v1  ;;  %3682 = vmatpush3.bf16.msra.mxu0 %v3681_v59 }
  0x50   :  { %3683 = vmatprep.subr.bf16.mxu0 %v3973_v0 }
  0x52   :  { %3204 = vmatmul.mubr.f32.gmra.mrb[14].mxu0 %v39_v33 }
  0x53   :  { %3206 = vmatprep.mubr.msk.f32.mxu0 %vm3974_vm0, %v3975_v1  ;;  %3685 = vmatpush3.bf16.msra.mxu0 %v3684_v62 }
  0x54   :  { %3686 = vmatprep.subr.bf16.mxu0 %v3973_v0 }
  0x56   :  { %3207 = vmatmul.mubr.f32.gmra.mrb[16].mxu0 %v40_v34 }
  0x57   :  { %3209 = vmatprep.mubr.msk.f32.mxu0 %vm3974_vm0, %v3975_v1 }
  0x5a   :  { %3210 = vmatmul.mubr.f32.gmra.mrb[18].mxu0 %v41_v35 }
  0x5b   :  { %3212 = vmatprep.mubr.msk.f32.mxu0 %vm3974_vm0, %v3975_v1 }
  0x5e   :  { %3213 = vmatmul.mubr.f32.gmra.mrb[20].mxu0 %v42_v36 }
  0x5f   :  { %3215 = vmatprep.mubr.msk.f32.mxu0 %vm3974_vm0, %v3975_v1 }
  0x62   :  { %3216 = vmatmul.mubr.f32.gmra.mrb[22].mxu0 %v43_v37 }
  0x63   :  { %3218 = vmatprep.mubr.msk.f32.mxu0 %vm3974_vm0, %v3975_v1 }
  0x66   :  { %3219 = vmatmul.mubr.f32.gmra.mrb[24].mxu0 %v44_v38 }
  0x67   :  { %3253 = vmatprep.mubr.msk.f32.mxu0 %vm3974_vm0, %v3975_v1 }
 0x109   :  { %v4197_v63 = vpop.f32.mrb[0].mxu0 }
 0x10a   :  { %v3184_v2 = vpop.f32.mrb[1].mxu0  ;;  %v213_v4 = vmul.f32 %v4197_v63, %v4197_v63 }
 0x10d   :  { %v4199_v3 = vpop.f32.mrb[2].mxu0 }
 0x10e   :  { %v193_v5 = vadd.f32 %v4199_v3, %v4197_v63  ;;  %v214_v6 = vmul.f32 %v4199_v3, %v4199_v3  ;;  %v3187_v7 = vpop.f32.mrb[3].mxu0 }
 0x110   :  { %v226_v8 = vadd.f32 %v214_v6, %v213_v4 }
 0x111   :  { %v4207_v9 = vpop.f32.mrb[4].mxu0 }
 0x112   :  { %v194_v10 = vadd.f32 %v193_v5, %v4207_v9  ;;  %v215_v11 = vmul.f32 %v4207_v9, %v4207_v9  ;;  %v3190_v12 = vpop.f32.mrb[5].mxu0 }
 0x114   :  { %v227_v13 = vadd.f32 %v226_v8, %v215_v11 }
 0x115   :  { %v4212_v14 = vpop.f32.mrb[6].mxu0 }
 0x116   :  { %v195_v15 = vadd.f32 %v194_v10, %v4212_v14  ;;  %v216_v16 = vmul.f32 %v4212_v14, %v4212_v14  ;;  %v3193_v17 = vpop.f32.mrb[7].mxu0 }
 0x118   :  { %v228_v18 = vadd.f32 %v227_v13, %v216_v16 }
 0x119   :  { %v4217_v19 = vpop.f32.mrb[8].mxu0 }
 0x11a   :  { %v196_v20 = vadd.f32 %v195_v15, %v4217_v19  ;;  %v217_v21 = vmul.f32 %v4217_v19, %v4217_v19  ;;  %v3196_v22 = vpop.f32.mrb[9].mxu0 }
 0x11c   :  { %v229_v23 = vadd.f32 %v228_v18, %v217_v21 }
 0x11d   :  { %v4222_v24 = vpop.f32.mrb[10].mxu0 }
 0x11e   :  { %v197_v25 = vadd.f32 %v196_v20, %v4222_v24  ;;  %v218_v26 = vmul.f32 %v4222_v24, %v4222_v24  ;;  %v3199_v27 = vpop.f32.mrb[11].mxu0 }
 0x120   :  { %v230_v28 = vadd.f32 %v229_v23, %v218_v26 }
 0x121   :  { %v4227_v29 = vpop.f32.mrb[12].mxu0 }
 0x122   :  { %v198_v30 = vadd.f32 %v197_v25, %v4227_v29  ;;  %v219_v31 = vmul.f32 %v4227_v29, %v4227_v29  ;;  %v3202_v32 = vpop.f32.mrb[13].mxu0 }
 0x124   :  { %v231_v33 = vadd.f32 %v230_v28, %v219_v31  ;;  %v255_v28 = vlaneseq  ;;  %v191_v31 = vld [vmem:[%s4655_s3] sm:$0x1] }
 0x125   :  { %v4232_v34 = vpop.f32.mrb[14].mxu0 }
 0x126   :  { %v199_v35 = vadd.f32 %v198_v30, %v4232_v34  ;;  %v220_v36 = vmul.f32 %v4232_v34, %v4232_v34  ;;  %v3205_v37 = vpop.f32.mrb[15].mxu0  ;;  %v256_v30 = vshrl.u32 %v255_v28, 7  ;;  %v2905_v28 = vld [vmem:[%s4653_s1 + $0x140] sm:$0xff] }
 0x128   :  { %v232_v38 = vadd.f32 %v231_v33, %v220_v36  ;;  %v4252_v32 = vsub.s32 0, %v256_v30  ;;  %v192_v36 = vld [vmem:[%s4655_s3 + $0x1] sm:$0x1]  ;;  %v2906_v30 = vld [vmem:[%s4653_s1 + $0x148] sm:$0xff] }
 0x129   :  { %v4237_v39 = vpop.f32.mrb[16].mxu0 }
 0x12a   :  { %v200_v40 = vadd.f32 %v199_v35, %v4237_v39  ;;  %v221_v41 = vmul.f32 %v4237_v39, %v4237_v39  ;;  %v3208_v42 = vpop.f32.mrb[17].mxu0 }
 0x12c   :  { %v233_v43 = vadd.f32 %v232_v38, %v221_v41 }
 0x12d   :  { %v4242_v44 = vpop.f32.mrb[18].mxu0 }
 0x12e   :  { %v201_v45 = vadd.f32 %v200_v40, %v4242_v44  ;;  %v222_v46 = vmul.f32 %v4242_v44, %v4242_v44  ;;  %v3211_v47 = vpop.f32.mrb[19].mxu0 }
 0x130   :  { %v234_v48 = vadd.f32 %v233_v43, %v222_v46 }
 0x131   :  { %v177_v49 = vpop.f32.mrb[20].mxu0 }
 0x132   :  { %v202_v50 = vadd.f32 %v201_v45, %v177_v49  ;;  %v223_v51 = vmul.f32 %v177_v49, %v177_v49  ;;  %v3214_v52 = vpop.f32.mrb[21].mxu0 }
 0x134   :  { %v235_v53 = vadd.f32 %v234_v48, %v223_v51 }
 0x135   :  { %v182_v54 = vpop.f32.mrb[22].mxu0 }
 0x136   :  { %v203_v55 = vadd.f32 %v202_v50, %v182_v54  ;;  %v224_v56 = vmul.f32 %v182_v54, %v182_v54  ;;  %v3217_v57 = vpop.f32.mrb[23].mxu0 }
 0x138   :  { %v236_v58 = vadd.f32 %v235_v53, %v224_v56 }
 0x139   :  { %v187_v59 = vpop.f32.mrb[24].mxu0 }
 0x13a   :  { %v205_v60 = vsel %vm204_vm1, %v187_v59, 0.0  ;;  %v225_v61 = vmul.f32 %v187_v59, %v187_v59  ;;  %v3220_v62 = vpop.f32.mrb[25].mxu0 }
 0x13b   :  { %v206_v2 = vadd.f32 %v205_v60, %v203_v55 }
 0x13c   :  { %v237_v4 = vsel %vm204_vm1, %v225_v61, 0.0 }
 0x13d   :  { %v207_v5 = vrot.slane %v206_v2, 4  ;;  %v238_v6 = vadd.f32 %v237_v4, %v236_v58 }
 0x13f   :  { %v208_v7 = vadd.f32 %v207_v5, %v206_v2  ;;  %v239_v8 = vrot.slane %v238_v6, 4 }
 0x141   :  { %v209_v10 = vrot.slane %v208_v7, 2  ;;  %v240_v11 = vadd.f32 %v239_v8, %v238_v6 }
 0x143   :  { %v210_v12 = vadd.f32 %v209_v10, %v208_v7  ;;  %v241_v13 = vrot.slane %v240_v11, 2 }
 0x145   :  { %v211_v15 = vrot.slane %v210_v12, 1  ;;  %v242_v16 = vadd.f32 %v241_v13, %v240_v11  ;;  %v2897_v13 = vld [vmem:[%s4653_s1 + $0x100] sm:$0xff] }
 0x147   :  { %v212_v17 = vadd.f32 %v211_v15, %v210_v12  ;;  %v243_v18 = vrot.slane %v242_v16, 1  ;;  %v2898_v15 = vld [vmem:[%s4653_s1 + $0x108] sm:$0xff] }
 0x149   :  { %v244_v20 = vadd.f32 %v243_v18, %v242_v16  ;;  %v245_v21 = vmul.f32 0.01, %v212_v17  ;;  %v3687_v16 = vpack.c.bf16 %v2898_v15, %v2897_v13  ;;  %v2899_v17 = vld [vmem:[%s4653_s1 + $0x110] sm:$0xff]  ;;  %v2900_v18 = vld [vmem:[%s4653_s1 + $0x118] sm:$0xff] }
 0x14b   :  { %v246_v22 = vmul.f32 0.01, %v244_v20  ;;  %v247_v23 = vmul.f32 %v245_v21, %v245_v21  ;;  %v3690_v20 = vpack.c.bf16 %v2900_v18, %v2899_v17 }
 0x14d   :  { %v248_v25 = vsub.f32 %v246_v22, %v247_v23  ;;  %v2902_v22 = vld [vmem:[%s4653_s1 + $0x128] sm:$0xff] }
 0x14f   :  { %v249_v26 = vmax.f32 %v248_v25, 0.0  ;;  %v2903_v25 = vld [vmem:[%s4653_s1 + $0x130] sm:$0xff] }
 0x151   :  { %v250_v27 = vadd.f32 1e-05, %v249_v26  ;;  %v2904_v26 = vld [vmem:[%s4653_s1 + $0x138] sm:$0xff] }
 0x153   :  { %3914 = vrsqrt.f32 %v250_v27  ;;  %v3696_v27 = vpack.c.bf16 %v2904_v26, %v2903_v25 }
 0x15d   :  { %v3915_v33 = vpop.eup %3914 }
 0x15e   :  { %v252_v35 = vmul.f32 %v3915_v33, %v191_v31  ;;  %v3699_v31 = vpack.c.bf16 %v2906_v30, %v2905_v28  ;;  %v2907_v33 = vld [vmem:[%s4653_s1 + $0x150] sm:$0xff] }
 0x160   :  { %v253_v37 = vmul.f32 %v252_v35, %v245_v21  ;;  %v258_v38 = vrot.slane %v252_v35, %v4252_v32  ;;  %v2901_v21 = vld [vmem:[%s4653_s1 + $0x120] sm:$0xff]  ;;  %v2908_v35 = vld [vmem:[%s4653_s1 + $0x158] sm:$0xff] }
 0x161   :  { %v3693_v23 = vpack.c.bf16 %v2902_v22, %v2901_v21 }
 0x162   :  { %v254_v40 = vsub.f32 %v192_v36, %v253_v37  ;;  %v271_v41 = vmul.f32 %v258_v38, %v187_v59  ;;  %v259_v42 = vmul.f32 %v258_v38, %v4197_v63  ;;  %v260_v43 = vmul.f32 %v258_v38, %v4199_v3  ;;  %v2909_v37 = vld [vmem:[%s4653_s1 + $0x160] sm:$0xff] }
 0x163   :  { %v261_v45 = vmul.f32 %v258_v38, %v4207_v9  ;;  %v262_v46 = vmul.f32 %v258_v38, %v4212_v14  ;;  %v263_v47 = vmul.f32 %v258_v38, %v4217_v19  ;;  %v264_v48 = vmul.f32 %v258_v38, %v4222_v24 }
 0x164   :  { %v275_v50 = vrot.slane %v254_v40, %v4252_v32  ;;  %v265_v51 = vmul.f32 %v258_v38, %v4227_v29  ;;  %v266_v52 = vmul.f32 %v258_v38, %v4232_v34  ;;  %v267_v53 = vmul.f32 %v258_v38, %v4237_v39 }
 0x165   :  { %v268_v63 = vmul.f32 %v258_v38, %v4242_v44  ;;  %v269_v55 = vmul.f32 %v258_v38, %v177_v49  ;;  %v270_v3 = vmul.f32 %v258_v38, %v182_v54  ;;  %v3702_v36 = vpack.c.bf16 %v2908_v35, %v2907_v33  ;;  %v2910_v38 = vld [vmem:[%s4653_s1 + $0x168] sm:$0xff] }
 0x166   :  { %v276_v56 = vadd.f32 %v275_v50, %v259_v42  ;;  %v277_v9 = vadd.f32 %v275_v50, %v260_v43  ;;  %v278_v57 = vadd.f32 %v275_v50, %v261_v45  ;;  %v279_v14 = vadd.f32 %v275_v50, %v262_v46  ;;  %v2912_v42 = vld [vmem:[%s4653_s1 + $0x178] sm:$0xff] }
 0x167   :  { %v280_v58 = vadd.f32 %v275_v50, %v263_v47  ;;  %v281_v19 = vadd.f32 %v275_v50, %v264_v48  ;;  %v282_v59 = vadd.f32 %v275_v50, %v265_v51  ;;  %v283_v24 = vadd.f32 %v275_v50, %v266_v52 }
 0x168   :  { %v289_v60 = vmax.f32 %v276_v56, 0.0  ;;  %v284_v61 = vadd.f32 %v275_v50, %v267_v53  ;;  %v285_v29 = vadd.f32 %v275_v50, %v268_v63  ;;  %v286_v62 = vadd.f32 %v275_v50, %v269_v55 }
 0x169   :  { %v287_v34 = vadd.f32 %v275_v50, %v270_v3  ;;  %v288_v39 = vadd.f32 %v275_v50, %v271_v41  ;;  %v290_v44 = vmax.f32 %v277_v9, 0.0  ;;  %v291_v49 = vmax.f32 %v278_v57, 0.0  ;;  %v2911_v41 = vld [vmem:[%s4653_s1 + $0x170] sm:$0xff] }
 0x16a   :  { %3254 = vmatmul.mubr.f32.vlgmr.msra.gmra.mrb[26].mxu0 %v289_v60  ;;  %v292_v54 = vmax.f32 %v279_v14, 0.0  ;;  %v293_v2 = vmax.f32 %v280_v58, 0.0  ;;  %v294_v4 = vmax.f32 %v281_v19, 0.0  ;;  %v295_v5 = vmax.f32 %v282_v59, 0.0 }
 0x16b   :  { %3256 = vmatprep.mubr.msk.f32.mxu0 %vm3974_vm0, %v3975_v1  ;;  %v296_v6 = vmax.f32 %v283_v24, 0.0  ;;  %v297_v7 = vmax.f32 %v284_v61, 0.0  ;;  %v298_v8 = vmax.f32 %v285_v29, 0.0  ;;  %v299_v10 = vmax.f32 %v286_v62, 0.0  ;;  %3688 = vmatpush3.bf16.msra.mxu0 %v3687_v16 }
 0x16c   :  { %v300_v11 = vmax.f32 %v287_v34, 0.0  ;;  %v301_v12 = vmax.f32 %v288_v39, 0.0  ;;  %3689 = vmatprep.subr.bf16.mxu0 %v3973_v0  ;;  %v3705_v40 = vpack.c.bf16 %v2910_v38, %v2909_v37  ;;  %v3708_v43 = vpack.c.bf16 %v2912_v42, %v2911_v41 }
 0x16e   :  { %3257 = vmatmul.mubr.f32.gmra.mrb[28].mxu0 %v290_v44 }
 0x16f   :  { %3259 = vmatprep.mubr.msk.f32.mxu0 %vm3974_vm0, %v3975_v1  ;;  %3691 = vmatpush3.bf16.msra.mxu0 %v3690_v20 }
 0x170   :  { %3692 = vmatprep.subr.bf16.mxu0 %v3973_v0 }
 0x172   :  { %3260 = vmatmul.mubr.f32.gmra.mrb[30].mxu0 %v291_v49 }
 0x173   :  { %3262 = vmatprep.mubr.msk.f32.mxu0 %vm3974_vm0, %v3975_v1  ;;  %3694 = vmatpush3.bf16.msra.mxu0 %v3693_v23 }
 0x174   :  { %3695 = vmatprep.subr.bf16.mxu0 %v3973_v0 }
 0x176   :  { %3263 = vmatmul.mubr.f32.gmra.mrb[32].mxu0 %v292_v54 }
 0x177   :  { %3265 = vmatprep.mubr.msk.f32.mxu0 %vm3974_vm0, %v3975_v1  ;;  %3697 = vmatpush3.bf16.msra.mxu0 %v3696_v27 }
 0x178   :  { %3698 = vmatprep.subr.bf16.mxu0 %v3973_v0 }
 0x17a   :  { %3266 = vmatmul.mubr.f32.gmra.mrb[34].mxu0 %v293_v2 }
 0x17b   :  { %3268 = vmatprep.mubr.msk.f32.mxu0 %vm3974_vm0, %v3975_v1  ;;  %3700 = vmatpush3.bf16.msra.mxu0 %v3699_v31 }
 0x17c   :  { %3701 = vmatprep.subr.bf16.mxu0 %v3973_v0 }
 0x17e   :  { %3269 = vmatmul.mubr.f32.gmra.mrb[36].mxu0 %v294_v4 }
 0x17f   :  { %3271 = vmatprep.mubr.msk.f32.mxu0 %vm3974_vm0, %v3975_v1  ;;  %3703 = vmatpush3.bf16.msra.mxu0 %v3702_v36 }
 0x180   :  { %3704 = vmatprep.subr.bf16.mxu0 %v3973_v0 }
 0x182   :  { %3272 = vmatmul.mubr.f32.gmra.mrb[38].mxu0 %v295_v5 }
 0x183   :  { %3274 = vmatprep.mubr.msk.f32.mxu0 %vm3974_vm0, %v3975_v1  ;;  %3706 = vmatpush3.bf16.msra.mxu0 %v3705_v40 }
 0x184   :  { %3707 = vmatprep.subr.bf16.mxu0 %v3973_v0 }
 0x186   :  { %3275 = vmatmul.mubr.f32.gmra.mrb[40].mxu0 %v296_v6 }
 0x187   :  { %3277 = vmatprep.mubr.msk.f32.mxu0 %vm3974_vm0, %v3975_v1  ;;  %3709 = vmatpush3.bf16.msra.mxu0 %v3708_v43 }
 0x188   :  { %3710 = vmatprep.subr.bf16.mxu0 %v3973_v0 }
 0x18a   :  { %3278 = vmatmul.mubr.f32.gmra.mrb[42].mxu0 %v297_v7 }
 0x18b   :  { %3280 = vmatprep.mubr.msk.f32.mxu0 %vm3974_vm0, %v3975_v1 }
 0x18e   :  { %3281 = vmatmul.mubr.f32.gmra.mrb[44].mxu0 %v298_v8 }
 0x18f   :  { %3283 = vmatprep.mubr.msk.f32.mxu0 %vm3974_vm0, %v3975_v1 }
 0x192   :  { %3284 = vmatmul.mubr.f32.gmra.mrb[46].mxu0 %v299_v10 }
 0x193   :  { %3286 = vmatprep.mubr.msk.f32.mxu0 %vm3974_vm0, %v3975_v1 }
 0x196   :  { %3287 = vmatmul.mubr.f32.gmra.mrb[48].mxu0 %v300_v11 }
 0x197   :  { %3289 = vmatprep.mubr.msk.f32.mxu0 %vm3974_vm0, %v3975_v1 }
 0x19a   :  { %3290 = vmatmul.mubr.f32.gmra.mrb[50].mxu0 %v301_v12 }
 0x19b   :  { %3324 = vmatprep.mubr.msk.f32.mxu0 %vm3974_vm0, %v3975_v1 }
 0x23d   :  { %v4351_v45 = vpop.f32.mrb[26].mxu0 }
 0x23e   :  { %v3255_v46 = vpop.f32.mrb[27].mxu0  ;;  %v470_v48 = vmul.f32 %v4351_v45, %v4351_v45 }
 0x241   :  { %v4353_v47 = vpop.f32.mrb[28].mxu0 }
 0x242   :  { %v451_v50 = vadd.f32 %v4353_v47, %v4351_v45  ;;  %v471_v51 = vmul.f32 %v4353_v47, %v4353_v47  ;;  %v3258_v52 = vpop.f32.mrb[29].mxu0 }
 0x244   :  { %v483_v53 = vadd.f32 %v471_v51, %v470_v48 }
 0x245   :  { %v4361_v63 = vpop.f32.mrb[30].mxu0 }
 0x246   :  { %v452_v55 = vadd.f32 %v451_v50, %v4361_v63  ;;  %v472_v3 = vmul.f32 %v4361_v63, %v4361_v63  ;;  %v3261_v56 = vpop.f32.mrb[31].mxu0 }
 0x248   :  { %v484_v9 = vadd.f32 %v483_v53, %v472_v3 }
 0x249   :  { %v4366_v57 = vpop.f32.mrb[32].mxu0 }
 0x24a   :  { %v453_v14 = vadd.f32 %v452_v55, %v4366_v57  ;;  %v473_v58 = vmul.f32 %v4366_v57, %v4366_v57  ;;  %v3264_v19 = vpop.f32.mrb[33].mxu0 }
 0x24c   :  { %v485_v59 = vadd.f32 %v484_v9, %v473_v58 }
 0x24d   :  { %v4371_v24 = vpop.f32.mrb[34].mxu0 }
 0x24e   :  { %v454_v60 = vadd.f32 %v453_v14, %v4371_v24  ;;  %v474_v61 = vmul.f32 %v4371_v24, %v4371_v24  ;;  %v3267_v29 = vpop.f32.mrb[35].mxu0 }
 0x250   :  { %v486_v62 = vadd.f32 %v485_v59, %v474_v61 }
 0x251   :  { %v4376_v34 = vpop.f32.mrb[36].mxu0 }
 0x252   :  { %v455_v39 = vadd.f32 %v454_v60, %v4376_v34  ;;  %v475_v44 = vmul.f32 %v4376_v34, %v4376_v34  ;;  %v3270_v49 = vpop.f32.mrb[37].mxu0 }
 0x254   :  { %v487_v54 = vadd.f32 %v486_v62, %v475_v44 }
 0x255   :  { %v4381_v2 = vpop.f32.mrb[38].mxu0 }
 0x256   :  { %v456_v4 = vadd.f32 %v455_v39, %v4381_v2  ;;  %v476_v5 = vmul.f32 %v4381_v2, %v4381_v2  ;;  %v3273_v6 = vpop.f32.mrb[39].mxu0 }
 0x258   :  { %v488_v7 = vadd.f32 %v487_v54, %v476_v5 }
 0x259   :  { %v4386_v8 = vpop.f32.mrb[40].mxu0 }
 0x25a   :  { %v457_v10 = vadd.f32 %v456_v4, %v4386_v8  ;;  %v477_v11 = vmul.f32 %v4386_v8, %v4386_v8  ;;  %v3276_v12 = vpop.f32.mrb[41].mxu0  ;;  %v449_v4 = vld [vmem:[%s4655_s3 + $0x2] sm:$0x1] }
 0x25c   :  { %v489_v13 = vadd.f32 %v488_v7, %v477_v11  ;;  %v450_v7 = vld [vmem:[%s4655_s3 + $0x3] sm:$0x1] }
 0x25d   :  { %v4391_v15 = vpop.f32.mrb[42].mxu0 }
 0x25e   :  { %v458_v16 = vadd.f32 %v457_v10, %v4391_v15  ;;  %v478_v17 = vmul.f32 %v4391_v15, %v4391_v15  ;;  %v3279_v18 = vpop.f32.mrb[43].mxu0 }
 0x260   :  { %v490_v20 = vadd.f32 %v489_v13, %v478_v17 }
 0x261   :  { %v430_v21 = vpop.f32.mrb[44].mxu0 }
 0x262   :  { %v459_v22 = vadd.f32 %v458_v16, %v430_v21  ;;  %v479_v23 = vmul.f32 %v430_v21, %v430_v21  ;;  %v3282_v25 = vpop.f32.mrb[45].mxu0 }
 0x264   :  { %v491_v26 = vadd.f32 %v490_v20, %v479_v23 }
 0x265   :  { %v435_v27 = vpop.f32.mrb[46].mxu0 }
 0x266   :  { %v460_v28 = vadd.f32 %v459_v22, %v435_v27  ;;  %v480_v30 = vmul.f32 %v435_v27, %v435_v27  ;;  %v3285_v31 = vpop.f32.mrb[47].mxu0 }
 0x268   :  { %v492_v33 = vadd.f32 %v491_v26, %v480_v30 }
 0x269   :  { %v440_v35 = vpop.f32.mrb[48].mxu0 }
 0x26a   :  { %v461_v36 = vadd.f32 %v460_v28, %v440_v35  ;;  %v481_v37 = vmul.f32 %v440_v35, %v440_v35  ;;  %v3288_v38 = vpop.f32.mrb[49].mxu0 }
 0x26c   :  { %v493_v40 = vadd.f32 %v492_v33, %v481_v37 }
 0x26d   :  { %v445_v41 = vpop.f32.mrb[50].mxu0 }
 0x26e   :  { %v462_v42 = vsel %vm204_vm1, %v445_v41, 0.0  ;;  %v482_v43 = vmul.f32 %v445_v41, %v445_v41  ;;  %v3291_v46 = vpop.f32.mrb[51].mxu0 }
 0x26f   :  { %v463_v48 = vadd.f32 %v462_v42, %v461_v36 }
 0x270   :  { %v494_v50 = vsel %vm204_vm1, %v482_v43, 0.0 }
 0x271   :  { %v464_v51 = vrot.slane %v463_v48, 4  ;;  %v495_v52 = vadd.f32 %v494_v50, %v493_v40 }
 0x273   :  { %v465_v53 = vadd.f32 %v464_v51, %v463_v48  ;;  %v496_v55 = vrot.slane %v495_v52, 4 }
 0x275   :  { %v466_v3 = vrot.slane %v465_v53, 2  ;;  %v497_v56 = vadd.f32 %v496_v55, %v495_v52 }
 0x277   :  { %v467_v9 = vadd.f32 %v466_v3, %v465_v53  ;;  %v498_v14 = vrot.slane %v497_v56, 2 }
 0x279   :  { %v468_v58 = vrot.slane %v467_v9, 1  ;;  %v499_v19 = vadd.f32 %v498_v14, %v497_v56  ;;  %v830_v56 = vld [vmem:[#allocation3] sm:$0xff] }
 0x27a   :  { %v836_v14 = vld [vmem:[#allocation3 + $0x20] sm:$0xff] }
 0x27b   :  { %v469_v59 = vadd.f32 %v468_v58, %v467_v9  ;;  %v500_v60 = vrot.slane %v499_v19, 1  ;;  %v831_v9 = vld [vmem:[#allocation3 + $0x8] sm:$0xff] }
 0x27c   :  { %v3717_v58 = vpack.c.bf16 %v831_v9, %v830_v56 }
 0x27d   :  { %v501_v61 = vadd.f32 %v500_v60, %v499_v19  ;;  %v502_v29 = vmul.f32 0.01, %v469_v59  ;;  %v837_v19 = vld [vmem:[#allocation3 + $0x28] sm:$0xff]  ;;  %v832_v59 = vld [vmem:[#allocation3 + $0x10] sm:$0xff]  ;;  %v833_v60 = vld [vmem:[#allocation3 + $0x18] sm:$0xff] }
 0x27e   :  { %3718 = vmatpush3.bf16.msra.mxu1 %v3717_v58 }
 0x27f   :  { %v503_v62 = vmul.f32 0.01, %v501_v61  ;;  %v504_v39 = vmul.f32 %v502_v29, %v502_v29  ;;  %v3711_v61 = vpack.c.bf16 %v837_v19, %v836_v14  ;;  %3719 = vmatprep.subr.bf16.mxu1 %v3973_v0 }
 0x281   :  { %v505_v44 = vsub.f32 %v503_v62, %v504_v39  ;;  %v839_v62 = vld [vmem:[#allocation3 + $0x38] sm:$0xff]  ;;  %v3720_v39 = vpack.c.bf16 %v833_v60, %v832_v59 }
 0x283   :  { %v506_v49 = vmax.f32 %v505_v44, 0.0  ;;  %3721 = vmatpush3.bf16.msra.mxu1 %v3720_v39 }
 0x284   :  { %3722 = vmatprep.subr.bf16.mxu1 %v3973_v0 }
 0x285   :  { %v507_v54 = vadd.f32 1e-05, %v506_v49 }
 0x287   :  { %3916 = vrsqrt.f32 %v507_v54 }
 0x291   :  { %v3917_v5 = vpop.eup %3916 }
 0x292   :  { %v509_v6 = vmul.f32 %v3917_v5, %v449_v4 }
 0x294   :  { %v510_v10 = vmul.f32 %v509_v6, %v502_v29  ;;  %v515_v11 = vrot.slane %v509_v6, %v4252_v32  ;;  %v838_v29 = vld [vmem:[#allocation3 + $0x30] sm:$0xff] }
 0x295   :  { %v3714_v44 = vpack.c.bf16 %v839_v62, %v838_v29 }
 0x296   :  { %v511_v12 = vsub.f32 %v450_v7, %v510_v10  ;;  %v528_v13 = vmul.f32 %v515_v11, %v445_v41  ;;  %v516_v16 = vmul.f32 %v515_v11, %v4351_v45  ;;  %v517_v17 = vmul.f32 %v515_v11, %v4353_v47 }
 0x297   :  { %v518_v18 = vmul.f32 %v515_v11, %v4361_v63  ;;  %v519_v20 = vmul.f32 %v515_v11, %v4366_v57  ;;  %v520_v22 = vmul.f32 %v515_v11, %v4371_v24  ;;  %v521_v23 = vmul.f32 %v515_v11, %v4376_v34 }
 0x298   :  { %v532_v25 = vrot.slane %v511_v12, %v4252_v32  ;;  %v522_v26 = vmul.f32 %v515_v11, %v4381_v2  ;;  %v523_v28 = vmul.f32 %v515_v11, %v4386_v8  ;;  %v524_v30 = vmul.f32 %v515_v11, %v4391_v15 }
 0x299   :  { %v525_v31 = vmul.f32 %v515_v11, %v430_v21  ;;  %v526_v45 = vmul.f32 %v515_v11, %v435_v27  ;;  %v527_v33 = vmul.f32 %v515_v11, %v440_v35 }
 0x29a   :  { %v533_v47 = vadd.f32 %v532_v25, %v516_v16  ;;  %v534_v36 = vadd.f32 %v532_v25, %v517_v17  ;;  %v535_v63 = vadd.f32 %v532_v25, %v518_v18  ;;  %v536_v37 = vadd.f32 %v532_v25, %v519_v20 }
 0x29b   :  { %v537_v57 = vadd.f32 %v532_v25, %v520_v22  ;;  %v538_v38 = vadd.f32 %v532_v25, %v521_v23  ;;  %v539_v24 = vadd.f32 %v532_v25, %v522_v26  ;;  %v540_v40 = vadd.f32 %v532_v25, %v523_v28 }
 0x29c   :  { %v546_v34 = vmax.f32 %v533_v47, 0.0  ;;  %v541_v41 = vadd.f32 %v532_v25, %v524_v30  ;;  %v542_v42 = vadd.f32 %v532_v25, %v525_v31  ;;  %v543_v2 = vadd.f32 %v532_v25, %v526_v45 }
 0x29d   :  { %v544_v43 = vadd.f32 %v532_v25, %v527_v33  ;;  %v545_v8 = vadd.f32 %v532_v25, %v528_v13  ;;  %v547_v15 = vmax.f32 %v534_v36, 0.0  ;;  %v548_v21 = vmax.f32 %v535_v63, 0.0 }
 0x29e   :  { %3325 = vmatmul.mubr.f32.vlgmr.msra.gmra.mrb[52].mxu0 %v546_v34  ;;  %v549_v27 = vmax.f32 %v536_v37, 0.0  ;;  %v550_v35 = vmax.f32 %v537_v57, 0.0  ;;  %v551_v46 = vmax.f32 %v538_v38, 0.0  ;;  %v552_v48 = vmax.f32 %v539_v24, 0.0 }
 0x29f   :  { %3327 = vmatprep.mubr.msk.f32.mxu0 %vm3974_vm0, %v3975_v1  ;;  %v553_v50 = vmax.f32 %v540_v40, 0.0  ;;  %v554_v51 = vmax.f32 %v541_v41, 0.0  ;;  %v555_v52 = vmax.f32 %v542_v42, 0.0  ;;  %v556_v53 = vmax.f32 %v543_v2, 0.0  ;;  %3712 = vmatpush3.bf16.msra.mxu0 %v3711_v61 }
 0x2a0   :  { %v557_v55 = vmax.f32 %v544_v43, 0.0  ;;  %v558_v3 = vmax.f32 %v545_v8, 0.0  ;;  %3713 = vmatprep.subr.bf16.mxu0 %v3973_v0 }
 0x2a2   :  { %3328 = vmatmul.mubr.f32.gmra.mrb[54].mxu0 %v547_v15 }
 0x2a3   :  { %3330 = vmatprep.mubr.msk.f32.mxu0 %vm3974_vm0, %v3975_v1  ;;  %3715 = vmatpush3.bf16.msra.mxu0 %v3714_v44 }
 0x2a6   :  { %3331 = vmatmul.mubr.f32.gmra.mrb[56].mxu0 %v548_v21 }
 0x2a7   :  { %3333 = vmatprep.mubr.msk.f32.mxu0 %vm3974_vm0, %v3975_v1 }
 0x2aa   :  { %3334 = vmatmul.mubr.f32.gmra.mrb[58].mxu0 %v549_v27 }
 0x2ab   :  { %3336 = vmatprep.mubr.msk.f32.mxu0 %vm3974_vm0, %v3975_v1 }
 0x2ae   :  { %3337 = vmatmul.mubr.f32.gmra.mrb[60].mxu0 %v550_v35 }
 0x2af   :  { %3339 = vmatprep.mubr.msk.f32.mxu0 %vm3974_vm0, %v3975_v1 }
 0x2b2   :  { %3340 = vmatmul.mubr.f32.gmra.mrb[62].mxu0 %v551_v46 }
 0x2b3   :  { %3342 = vmatprep.mubr.msk.f32.mxu0 %vm3974_vm0, %v3975_v1 }
 0x2b6   :  { %3343 = vmatmul.mubr.f32.gmra.mrb[64].mxu0 %v552_v48 }
 0x2b7   :  { %3345 = vmatprep.mubr.msk.f32.mxu0 %vm3974_vm0, %v3975_v1 }
 0x2ba   :  { %3346 = vmatmul.mubr.f32.gmra.mrb[66].mxu0 %v553_v50 }
 0x2bb   :  { %3348 = vmatprep.mubr.msk.f32.mxu0 %vm3974_vm0, %v3975_v1 }
 0x2be   :  { %3349 = vmatmul.mubr.f32.gmra.mrb[68].mxu0 %v554_v51 }
 0x2bf   :  { %3351 = vmatprep.mubr.msk.f32.mxu0 %vm3974_vm0, %v3975_v1 }
 0x2c2   :  { %3352 = vmatmul.mubr.f32.gmra.mrb[70].mxu0 %v555_v52 }
 0x2c3   :  { %3354 = vmatprep.mubr.msk.f32.mxu0 %vm3974_vm0, %v3975_v1 }
 0x2c6   :  { %3355 = vmatmul.mubr.f32.gmra.mrb[72].mxu0 %v556_v53 }
 0x2c7   :  { %3357 = vmatprep.mubr.msk.f32.mxu0 %vm3974_vm0, %v3975_v1 }
 0x2ca   :  { %3358 = vmatmul.mubr.f32.gmra.mrb[74].mxu0 %v557_v55 }
 0x2cb   :  { %3360 = vmatprep.mubr.msk.f32.mxu0 %vm3974_vm0, %v3975_v1 }
 0x2ce   :  { %3361 = vmatmul.mubr.f32.gmra.mrb[76].mxu0 %v558_v3 }
 0x2cf   :  { %3371 = vmatprep.mubr.msk.f32.mxu0 %vm3974_vm0, %v3975_v1 }
 0x371   :  { %v4444_v49 = vpop.f32.mrb[52].mxu0 }
 0x372   :  { %v3326_v54 = vpop.f32.mrb[53].mxu0  ;;  %v727_v5 = vmul.f32 %v4444_v49, %v4444_v49 }
 0x375   :  { %v4446_v4 = vpop.f32.mrb[54].mxu0 }
 0x376   :  { %v708_v6 = vadd.f32 %v4446_v4, %v4444_v49  ;;  %v728_v7 = vmul.f32 %v4446_v4, %v4446_v4  ;;  %v3329_v10 = vpop.f32.mrb[55].mxu0 }
 0x378   :  { %v740_v11 = vadd.f32 %v728_v7, %v727_v5 }
 0x379   :  { %v4454_v12 = vpop.f32.mrb[56].mxu0 }
 0x37a   :  { %v709_v13 = vadd.f32 %v708_v6, %v4454_v12  ;;  %v729_v16 = vmul.f32 %v4454_v12, %v4454_v12  ;;  %v3332_v17 = vpop.f32.mrb[57].mxu0 }
 0x37c   :  { %v741_v18 = vadd.f32 %v740_v11, %v729_v16 }
 0x37d   :  { %v4459_v20 = vpop.f32.mrb[58].mxu0 }
 0x37e   :  { %v710_v22 = vadd.f32 %v709_v13, %v4459_v20  ;;  %v730_v23 = vmul.f32 %v4459_v20, %v4459_v20  ;;  %v3335_v25 = vpop.f32.mrb[59].mxu0 }
 0x380   :  { %v742_v26 = vadd.f32 %v741_v18, %v730_v23 }
 0x381   :  { %v4464_v28 = vpop.f32.mrb[60].mxu0 }
 0x382   :  { %v711_v30 = vadd.f32 %v710_v22, %v4464_v28  ;;  %v731_v31 = vmul.f32 %v4464_v28, %v4464_v28  ;;  %v3338_v45 = vpop.f32.mrb[61].mxu0 }
 0x384   :  { %v743_v33 = vadd.f32 %v742_v26, %v731_v31 }
 0x385   :  { %v4469_v47 = vpop.f32.mrb[62].mxu0 }
 0x386   :  { %v712_v36 = vadd.f32 %v711_v30, %v4469_v47  ;;  %v732_v63 = vmul.f32 %v4469_v47, %v4469_v47  ;;  %v3341_v37 = vpop.f32.mrb[63].mxu0 }
 0x388   :  { %v744_v57 = vadd.f32 %v743_v33, %v732_v63 }
 0x389   :  { %v4474_v38 = vpop.f32.mrb[64].mxu0 }
 0x38a   :  { %v713_v24 = vadd.f32 %v712_v36, %v4474_v38  ;;  %v733_v40 = vmul.f32 %v4474_v38, %v4474_v38  ;;  %v3344_v34 = vpop.f32.mrb[65].mxu0 }
 0x38c   :  { %v745_v41 = vadd.f32 %v744_v57, %v733_v40 }
 0x38d   :  { %v4479_v42 = vpop.f32.mrb[66].mxu0 }
 0x38e   :  { %v714_v2 = vadd.f32 %v713_v24, %v4479_v42  ;;  %v734_v43 = vmul.f32 %v4479_v42, %v4479_v42  ;;  %v3347_v8 = vpop.f32.mrb[67].mxu0  ;;  %v706_v24 = vld [vmem:[%s4655_s3 + $0x4] sm:$0x1] }
 0x390   :  { %v746_v15 = vadd.f32 %v745_v41, %v734_v43  ;;  %v707_v41 = vld [vmem:[%s4655_s3 + $0x5] sm:$0x1] }
 0x391   :  { %v4484_v21 = vpop.f32.mrb[68].mxu0 }
 0x392   :  { %v715_v27 = vadd.f32 %v714_v2, %v4484_v21  ;;  %v735_v35 = vmul.f32 %v4484_v21, %v4484_v21  ;;  %v3350_v46 = vpop.f32.mrb[69].mxu0 }
 0x394   :  { %v747_v48 = vadd.f32 %v746_v15, %v735_v35 }
 0x395   :  { %v687_v50 = vpop.f32.mrb[70].mxu0 }
 0x396   :  { %v716_v51 = vadd.f32 %v715_v27, %v687_v50  ;;  %v736_v52 = vmul.f32 %v687_v50, %v687_v50  ;;  %v3353_v53 = vpop.f32.mrb[71].mxu0 }
 0x398   :  { %v748_v55 = vadd.f32 %v747_v48, %v736_v52 }
 0x399   :  { %v692_v3 = vpop.f32.mrb[72].mxu0 }
 0x39a   :  { %v717_v56 = vadd.f32 %v716_v51, %v692_v3  ;;  %v737_v9 = vmul.f32 %v692_v3, %v692_v3  ;;  %v3356_v14 = vpop.f32.mrb[73].mxu0 }
 0x39c   :  { %v749_v58 = vadd.f32 %v748_v55, %v737_v9 }
 0x39d   :  { %v4489_v19 = vpop.f32.mrb[74].mxu0 }
 0x39e   :  { %v718_v59 = vadd.f32 %v717_v56, %v4489_v19  ;;  %v738_v60 = vmul.f32 %v4489_v19, %v4489_v19  ;;  %v3359_v61 = vpop.f32.mrb[75].mxu0 }
 0x3a0   :  { %v750_v29 = vadd.f32 %v749_v58, %v738_v60 }
 0x3a1   :  { %v702_v62 = vpop.f32.mrb[76].mxu0 }
 0x3a2   :  { %v719_v39 = vsel %vm204_vm1, %v702_v62, 0.0  ;;  %v739_v44 = vmul.f32 %v702_v62, %v702_v62  ;;  %v3362_v54 = vpop.f32.mrb[77].mxu0 }
 0x3a3   :  { %v720_v5 = vadd.f32 %v719_v39, %v718_v59 }
 0x3a4   :  { %v751_v6 = vsel %vm204_vm1, %v739_v44, 0.0 }
 0x3a5   :  { %v721_v7 = vrot.slane %v720_v5, 4  ;;  %v752_v10 = vadd.f32 %v751_v6, %v750_v29 }
 0x3a7   :  { %v722_v11 = vadd.f32 %v721_v7, %v720_v5  ;;  %v753_v13 = vrot.slane %v752_v10, 4  ;;  %v989_v7 = vld [vmem:[#allocation3 + $0x40] sm:$0xff] }
 0x3a9   :  { %v723_v16 = vrot.slane %v722_v11, 2  ;;  %v754_v17 = vadd.f32 %v753_v13, %v752_v10  ;;  %v990_v10 = vld [vmem:[#allocation3 + $0x48] sm:$0xff] }
 0x3ab   :  { %v724_v18 = vadd.f32 %v723_v16, %v722_v11  ;;  %v755_v22 = vrot.slane %v754_v17, 2 }
 0x3ad   :  { %v725_v23 = vrot.slane %v724_v18, 1  ;;  %v756_v25 = vadd.f32 %v755_v22, %v754_v17  ;;  %v3723_v22 = vpack.c.bf16 %v990_v10, %v989_v7 }
 0x3af   :  { %v726_v26 = vadd.f32 %v725_v23, %v724_v18  ;;  %v757_v30 = vrot.slane %v756_v25, 1 }
 0x3b1   :  { %v758_v31 = vadd.f32 %v757_v30, %v756_v25  ;;  %v759_v45 = vmul.f32 0.01, %v726_v26  ;;  %v991_v25 = vld [vmem:[#allocation3 + $0x50] sm:$0xff]  ;;  %v992_v26 = vld [vmem:[#allocation3 + $0x58] sm:$0xff] }
 0x3b3   :  { %v760_v33 = vmul.f32 0.01, %v758_v31  ;;  %v761_v36 = vmul.f32 %v759_v45, %v759_v45 }
 0x3b5   :  { %v762_v63 = vsub.f32 %v760_v33, %v761_v36  ;;  %v1070_v33 = vld [vmem:[#allocation3 + $0x68] sm:$0xff] }
 0x3b7   :  { %v763_v37 = vmax.f32 %v762_v63, 0.0  ;;  %v1071_v63 = vld [vmem:[#allocation3 + $0x70] sm:$0xff] }
 0x3b9   :  { %v764_v57 = vadd.f32 1e-05, %v763_v37  ;;  %v1072_v37 = vld [vmem:[#allocation3 + $0x78] sm:$0xff] }
 0x3bb   :  { %3918 = vrsqrt.f32 %v764_v57 }
 0x3c5   :  { %v3919_v40 = vpop.eup %3918 }
 0x3c6   :  { %v766_v34 = vmul.f32 %v3919_v40, %v706_v24  ;;  %v3732_v24 = vpack.c.bf16 %v1072_v37, %v1071_v63  ;;  %v1149_v40 = vld [vmem:[#allocation3 + $0x80] sm:$0xff]  ;;  %v1790_v63 = vld [vmem:[#allocation3 + $0x188] sm:$0xff] }
 0x3c8   :  { %v767_v2 = vmul.f32 %v766_v34, %v759_v45  ;;  %v772_v43 = vrot.slane %v766_v34, %v4252_v32  ;;  %v1069_v45 = vld [vmem:[#allocation3 + $0x60] sm:$0xff]  ;;  %v1150_v34 = vld [vmem:[#allocation3 + $0x88] sm:$0xff] }
 0x3c9   :  { %v3729_v36 = vpack.c.bf16 %v1070_v33, %v1069_v45 }
 0x3ca   :  { %v768_v8 = vsub.f32 %v707_v41, %v767_v2  ;;  %v785_v15 = vmul.f32 %v772_v43, %v702_v62  ;;  %v773_v27 = vmul.f32 %v772_v43, %v4444_v49  ;;  %v774_v35 = vmul.f32 %v772_v43, %v4446_v4  ;;  %v1151_v2 = vld [vmem:[#allocation3 + $0x90] sm:$0xff] }
 0x3cb   :  { %v775_v46 = vmul.f32 %v772_v43, %v4454_v12  ;;  %v776_v48 = vmul.f32 %v772_v43, %v4459_v20  ;;  %v777_v51 = vmul.f32 %v772_v43, %v4464_v28  ;;  %v778_v52 = vmul.f32 %v772_v43, %v4469_v47 }
 0x3cc   :  { %v789_v53 = vrot.slane %v768_v8, %v4252_v32  ;;  %v779_v55 = vmul.f32 %v772_v43, %v4474_v38  ;;  %v780_v56 = vmul.f32 %v772_v43, %v4479_v42  ;;  %v781_v9 = vmul.f32 %v772_v43, %v4484_v21 }
 0x3cd   :  { %v782_v14 = vmul.f32 %v772_v43, %v687_v50  ;;  %v783_v49 = vmul.f32 %v772_v43, %v692_v3  ;;  %v784_v6 = vmul.f32 %v772_v43, %v4489_v19  ;;  %v3726_v19 = vpack.c.bf16 %v992_v26, %v991_v25  ;;  %v1152_v43 = vld [vmem:[#allocation3 + $0x98] sm:$0xff]  ;;  %v1709_v25 = vld [vmem:[#allocation3 + $0x160] sm:$0xff]  ;;  %v1710_v26 = vld [vmem:[#allocation3 + $0x168] sm:$0xff] }
 0x3ce   :  { %v802_v58 = vadd.f32 %v789_v53, %v785_v15  ;;  %v790_v4 = vadd.f32 %v789_v53, %v773_v27  ;;  %v791_v59 = vadd.f32 %v789_v53, %v774_v35  ;;  %v792_v12 = vadd.f32 %v789_v53, %v775_v46  ;;  %v1229_v27 = vld [vmem:[#allocation3 + $0xa0] sm:$0xff]  ;;  %v1230_v35 = vld [vmem:[#allocation3 + $0xa8] sm:$0xff] }
 0x3cf   :  { %v793_v60 = vadd.f32 %v789_v53, %v776_v48  ;;  %v794_v20 = vadd.f32 %v789_v53, %v777_v51  ;;  %v795_v61 = vadd.f32 %v789_v53, %v778_v52  ;;  %v796_v28 = vadd.f32 %v789_v53, %v779_v55  ;;  %v1231_v48 = vld [vmem:[#allocation3 + $0xb0] sm:$0xff]  ;;  %v1232_v51 = vld [vmem:[#allocation3 + $0xb8] sm:$0xff]  ;;  %v1309_v55 = vld [vmem:[#allocation3 + $0xc0] sm:$0xff] }
 0x3d0   :  { %v815_v29 = vmax.f32 %v802_v58, 0.0  ;;  %v803_v47 = vmax.f32 %v790_v4, 0.0  ;;  %v804_v62 = vmax.f32 %v791_v59, 0.0  ;;  %v805_v39 = vmax.f32 %v792_v12, 0.0  ;;  %v1389_v59 = vld [vmem:[#allocation3 + $0xe0] sm:$0xff]  ;;  %v1390_v12 = vld [vmem:[#allocation3 + $0xe8] sm:$0xff] }
 0x3d1   :  { %v806_v44 = vmax.f32 %v793_v60, 0.0  ;;  %v807_v38 = vmax.f32 %v794_v20, 0.0  ;;  %v808_v54 = vmax.f32 %v795_v61, 0.0  ;;  %v809_v42 = vmax.f32 %v796_v28, 0.0  ;;  %v1391_v20 = vld [vmem:[#allocation3 + $0xf0] sm:$0xff]  ;;  %v1392_v61 = vld [vmem:[#allocation3 + $0xf8] sm:$0xff] }
 0x3d2   :  { %828 = vst [vmem:[#allocation2 + $0x60] sm:$0xf] %v815_v29  ;;  %816 = vst [vmem:[#allocation2] sm:$0xff] %v803_v47  ;;  %v797_v21 = vadd.f32 %v789_v53, %v780_v56  ;;  %v798_v50 = vadd.f32 %v789_v53, %v781_v9  ;;  %v799_v3 = vadd.f32 %v789_v53, %v782_v14  ;;  %v1310_v56 = vld [vmem:[#allocation3 + $0xc8] sm:$0xff]  ;;  %v1311_v14 = vld [vmem:[#allocation3 + $0xd0] sm:$0xff] }
 0x3d3   :  { %817 = vst [vmem:[#allocation2 + $0x8] sm:$0xff] %v804_v62  ;;  %818 = vst [vmem:[#allocation2 + $0x10] sm:$0xff] %v805_v39  ;;  %v800_v5 = vadd.f32 %v789_v53, %v783_v49  ;;  %v801_v18 = vadd.f32 %v789_v53, %v784_v6  ;;  %v3735_v41 = vpack.c.bf16 %v1150_v34, %v1149_v40  ;;  %v1312_v49 = vld [vmem:[#allocation3 + $0xd8] sm:$0xff]  ;;  %v1469_v47 = vld [vmem:[#allocation3 + $0x100] sm:$0xff] }
 0x3d4   :  { %819 = vst [vmem:[#allocation2 + $0x18] sm:$0xff] %v806_v44  ;;  %820 = vst [vmem:[#allocation2 + $0x20] sm:$0xff] %v807_v38  ;;  %v810_v11 = vmax.f32 %v797_v21, 0.0  ;;  %v811_v13 = vmax.f32 %v798_v50, 0.0  ;;  %v812_v16 = vmax.f32 %v799_v3, 0.0  ;;  %v3738_v15 = vpack.c.bf16 %v1152_v43, %v1151_v2  ;;  %v1470_v62 = vld [vmem:[#allocation3 + $0x108] sm:$0xff] }
 0x3d5   :  { %821 = vst [vmem:[#allocation2 + $0x28] sm:$0xff] %v808_v54  ;;  %822 = vst [vmem:[#allocation2 + $0x30] sm:$0xff] %v809_v42  ;;  %v813_v17 = vmax.f32 %v800_v5, 0.0  ;;  %v814_v23 = vmax.f32 %v801_v18, 0.0  ;;  %v3741_v46 = vpack.c.bf16 %v1230_v35, %v1229_v27  ;;  %v3744_v53 = vpack.c.bf16 %v1232_v51, %v1231_v48  ;;  %v1471_v44 = vld [vmem:[#allocation3 + $0x110] sm:$0xff]  ;;  %v1472_v38 = vld [vmem:[#allocation3 + $0x118] sm:$0xff] }
 0x3d6   :  { %823 = vst [vmem:[#allocation2 + $0x38] sm:$0xff] %v810_v11  ;;  %824 = vst [vmem:[#allocation2 + $0x40] sm:$0xff] %v811_v13  ;;  %v3747_v9 = vpack.c.bf16 %v1310_v56, %v1309_v55  ;;  %v3750_v4 = vpack.c.bf16 %v1312_v49, %v1311_v14  ;;  %v3753_v60 = vpack.c.bf16 %v1390_v12, %v1389_v59  ;;  %v1549_v21 = vld [vmem:[#allocation3 + $0x120] sm:$0xff]  ;;  %v1550_v50 = vld [vmem:[#allocation3 + $0x128] sm:$0xff] }
 0x3d7   :  { %825 = vst [vmem:[#allocation2 + $0x48] sm:$0xff] %v812_v16  ;;  %826 = vst [vmem:[#allocation2 + $0x50] sm:$0xff] %v813_v17  ;;  %v3756_v29 = vpack.c.bf16 %v1392_v61, %v1391_v20  ;;  %v3759_v39 = vpack.c.bf16 %v1470_v62, %v1469_v47  ;;  %v3762_v42 = vpack.c.bf16 %v1472_v38, %v1471_v44  ;;  %v1551_v5 = vld [vmem:[#allocation3 + $0x130] sm:$0xff]  ;;  %v1552_v6 = vld [vmem:[#allocation3 + $0x138] sm:$0xff] }
 0x3d8   :  { %827 = vst [vmem:[#allocation2 + $0x58] sm:$0xff] %v814_v23  ;;  %v3765_v3 = vpack.c.bf16 %v1550_v50, %v1549_v21  ;;  %v3768_v10 = vpack.c.bf16 %v1552_v6, %v1551_v5  ;;  %v1629_v11 = vld [vmem:[#allocation3 + $0x140] sm:$0xff]  ;;  %v1630_v13 = vld [vmem:[#allocation3 + $0x148] sm:$0xff]  ;;  %v1631_v17 = vld [vmem:[#allocation3 + $0x150] sm:$0xff] }
 0x3d9   :  { %v834_v30 = vld [vmem:[#allocation2 + $0x4] sm:$0xf]  ;;  %v829_v31 = vld [vmem:[#allocation2] sm:$0xf]  ;;  %v3771_v16 = vpack.c.bf16 %v1630_v13, %v1629_v11  ;;  %v1870_v2 = vld [vmem:[#allocation3 + $0x1a8] sm:$0xff] }
 0x3da   :  { %3372 = vmatmul.mubr.msk.f32.vlgmr.msra.gmra.mrb[78].mxu0 %vm840_vm2, %v834_v30  ;;  %3383 = vmatmul.mubr.msk.f32.vlgmr.msra.gmra.mrb[0].mxu1 %vm840_vm2, %v829_v31  ;;  %v987_v57 = vld [vmem:[#allocation2 + $0x8] sm:$0xf]  ;;  %v1067_v8 = vld [vmem:[#allocation2 + $0xc] sm:$0xf]  ;;  %v1147_v52 = vld [vmem:[#allocation2 + $0x10] sm:$0xf]  ;;  %v3777_v30 = vpack.c.bf16 %v1710_v26, %v1709_v25 }
 0x3db   :  { %3724 = vmatpush3.bf16.msra.mxu1 %v3723_v22  ;;  %3393 = vmatprep.mubr.msk.f32.mxu1 %vm3974_vm0, %v3975_v1  ;;  %v1227_v58 = vld [vmem:[#allocation2 + $0x14] sm:$0xf]  ;;  %v1307_v28 = vld [vmem:[#allocation2 + $0x18] sm:$0xf]  ;;  %v1387_v54 = vld [vmem:[#allocation2 + $0x1c] sm:$0xf] }
 0x3dc   :  { %3725 = vmatprep.subr.bf16.mxu1 %v3973_v0  ;;  %v1467_v7 = vld [vmem:[#allocation2 + $0x20] sm:$0xf]  ;;  %v1547_v22 = vld [vmem:[#allocation2 + $0x24] sm:$0xf]  ;;  %v1711_v31 = vld [vmem:[#allocation3 + $0x170] sm:$0xff] }
 0x3dd   :  { %v1632_v18 = vld [vmem:[#allocation3 + $0x158] sm:$0xff]  ;;  %v1627_v45 = vld [vmem:[#allocation2 + $0x28] sm:$0xf]  ;;  %v1707_v40 = vld [vmem:[#allocation2 + $0x2c] sm:$0xf] }
 0x3de   :  { %v3774_v23 = vpack.c.bf16 %v1632_v18, %v1631_v17  ;;  %v1787_v27 = vld [vmem:[#allocation2 + $0x30] sm:$0xf]  ;;  %v1867_v55 = vld [vmem:[#allocation2 + $0x34] sm:$0xf]  ;;  %v1947_v59 = vld [vmem:[#allocation2 + $0x38] sm:$0xf] }
 0x3df   :  { %3727 = vmatpush3.bf16.msra.mxu1 %v3726_v19  ;;  %v1712_v19 = vld [vmem:[#allocation3 + $0x178] sm:$0xff]  ;;  %v1950_v48 = vld [vmem:[#allocation3 + $0x1c8] sm:$0xff]  ;;  %v2027_v47 = vld [vmem:[#allocation2 + $0x3c] sm:$0xf] }
 0x3e0   :  { %3728 = vmatprep.subr.bf16.mxu1 %v3973_v0  ;;  %v3780_v33 = vpack.c.bf16 %v1712_v19, %v1711_v31  ;;  %v2030_v14 = vld [vmem:[#allocation3 + $0x1e8] sm:$0xff]  ;;  %v2107_v21 = vld [vmem:[#allocation2 + $0x40] sm:$0xf]  ;;  %v2187_v11 = vld [vmem:[#allocation2 + $0x44] sm:$0xf] }
 0x3e1   :  { %v2110_v20 = vld [vmem:[#allocation3 + $0x208] sm:$0xff]  ;;  %v2267_v25 = vld [vmem:[#allocation2 + $0x48] sm:$0xf] }
 0x3e2   :  { %3394 = vmatmul.mubr.msk.f32.vlgmr.msra.gmra.mrb[0].mxu1 %vm840_vm2, %v987_v57  ;;  %v1791_v57 = vld [vmem:[#allocation3 + $0x190] sm:$0xff]  ;;  %v2190_v44 = vld [vmem:[#allocation3 + $0x228] sm:$0xff] }
 0x3e3   :  { %3730 = vmatpush3.bf16.msra.mxu1 %v3729_v36  ;;  %3404 = vmatprep.mubr.msk.f32.mxu1 %vm3974_vm0, %v3975_v1  ;;  %v1789_v36 = vld [vmem:[#allocation3 + $0x180] sm:$0xff]  ;;  %v2270_v5 = vld [vmem:[#allocation3 + $0x248] sm:$0xff] }
 0x3e4   :  { %3731 = vmatprep.subr.bf16.mxu1 %v3973_v0  ;;  %v3783_v37 = vpack.c.bf16 %v1790_v63, %v1789_v36  ;;  %v2350_v17 = vld [vmem:[#allocation3 + $0x268] sm:$0xff]  ;;  %v2347_v36 = vld [vmem:[#allocation2 + $0x4c] sm:$0xf] }
 0x3e5   :  { %v2430_v31 = vld [vmem:[#allocation3 + $0x288] sm:$0xff] }
 0x3e7   :  { %3733 = vmatpush3.bf16.msra.mxu1 %v3732_v24  ;;  %v1792_v24 = vld [vmem:[#allocation3 + $0x198] sm:$0xff] }
 0x3e8   :  { %3734 = vmatprep.subr.bf16.mxu1 %v3973_v0  ;;  %v3786_v34 = vpack.c.bf16 %v1792_v24, %v1791_v57  ;;  %v2510_v57 = vld [vmem:[#allocation3 + $0x2a8] sm:$0xff] }
 0x3ea   :  { %3405 = vmatmul.mubr.msk.f32.vlgmr.msra.gmra.mrb[0].mxu1 %vm840_vm2, %v1067_v8  ;;  %v1871_v8 = vld [vmem:[#allocation3 + $0x1b0] sm:$0xff] }
 0x3eb   :  { %3736 = vmatpush3.bf16.msra.mxu1 %v3735_v41  ;;  %3415 = vmatprep.mubr.msk.f32.mxu1 %vm3974_vm0, %v3975_v1  ;;  %v1869_v41 = vld [vmem:[#allocation3 + $0x1a0] sm:$0xff] }
 0x3ec   :  { %3737 = vmatprep.subr.bf16.mxu1 %v3973_v0  ;;  %v3789_v43 = vpack.c.bf16 %v1870_v2, %v1869_v41  ;;  %v2427_v41 = vld [vmem:[#allocation2 + $0x50] sm:$0xf] }
 0x3ef   :  { %3739 = vmatpush3.bf16.msra.mxu1 %v3738_v15  ;;  %v1872_v15 = vld [vmem:[#allocation3 + $0x1b8] sm:$0xff] }
 0x3f0   :  { %3740 = vmatprep.subr.bf16.mxu1 %v3973_v0  ;;  %v3792_v35 = vpack.c.bf16 %v1872_v15, %v1871_v8  ;;  %v2590_v8 = vld [vmem:[#allocation3 + $0x2c8] sm:$0xff] }
 0x3f2   :  { %3416 = vmatmul.mubr.msk.f32.vlgmr.msra.gmra.mrb[0].mxu1 %vm840_vm2, %v1147_v52  ;;  %v1951_v52 = vld [vmem:[#allocation3 + $0x1d0] sm:$0xff] }
 0x3f3   :  { %3742 = vmatpush3.bf16.msra.mxu1 %v3741_v46  ;;  %3426 = vmatprep.mubr.msk.f32.mxu1 %vm3974_vm0, %v3975_v1  ;;  %v1949_v46 = vld [vmem:[#allocation3 + $0x1c0] sm:$0xff] }
 0x3f4   :  { %3743 = vmatprep.subr.bf16.mxu1 %v3973_v0  ;;  %v3795_v51 = vpack.c.bf16 %v1950_v48, %v1949_v46  ;;  %v2507_v46 = vld [vmem:[#allocation2 + $0x54] sm:$0xf] }
 0x3f7   :  { %3745 = vmatpush3.bf16.msra.mxu1 %v3744_v53  ;;  %v1952_v53 = vld [vmem:[#allocation3 + $0x1d8] sm:$0xff] }
 0x3f8   :  { %3746 = vmatprep.subr.bf16.mxu1 %v3973_v0  ;;  %v3798_v56 = vpack.c.bf16 %v1952_v53, %v1951_v52  ;;  %v2670_v52 = vld [vmem:[#allocation3 + $0x2e8] sm:$0xff] }
 0x3fa   :  { %3427 = vmatmul.mubr.msk.f32.vlgmr.msra.gmra.mrb[0].mxu1 %vm840_vm2, %v1227_v58  ;;  %v2031_v58 = vld [vmem:[#allocation3 + $0x1f0] sm:$0xff] }
 0x3fb   :  { %3748 = vmatpush3.bf16.msra.mxu1 %v3747_v9  ;;  %3437 = vmatprep.mubr.msk.f32.mxu1 %vm3974_vm0, %v3975_v1  ;;  %v2029_v9 = vld [vmem:[#allocation3 + $0x1e0] sm:$0xff] }
 0x3fc   :  { %3749 = vmatprep.subr.bf16.mxu1 %v3973_v0  ;;  %v3801_v49 = vpack.c.bf16 %v2030_v14, %v2029_v9  ;;  %v2587_v9 = vld [vmem:[#allocation2 + $0x58] sm:$0xf] }
 0x3ff   :  { %3751 = vmatpush3.bf16.msra.mxu1 %v3750_v4  ;;  %v2032_v4 = vld [vmem:[#allocation3 + $0x1f8] sm:$0xff] }
 0x400   :  { %3752 = vmatprep.subr.bf16.mxu1 %v3973_v0  ;;  %v3804_v12 = vpack.c.bf16 %v2032_v4, %v2031_v58  ;;  %v2750_v58 = vld [vmem:[#allocation3 + $0x308] sm:$0xff] }
 0x402   :  { %3438 = vmatmul.mubr.msk.f32.vlgmr.msra.gmra.mrb[0].mxu1 %vm840_vm2, %v1307_v28  ;;  %v2111_v28 = vld [vmem:[#allocation3 + $0x210] sm:$0xff] }
 0x403   :  { %3754 = vmatpush3.bf16.msra.mxu1 %v3753_v60  ;;  %3448 = vmatprep.mubr.msk.f32.mxu1 %vm3974_vm0, %v3975_v1  ;;  %v2109_v60 = vld [vmem:[#allocation3 + $0x200] sm:$0xff] }
 0x404   :  { %3755 = vmatprep.subr.bf16.mxu1 %v3973_v0  ;;  %v3807_v61 = vpack.c.bf16 %v2110_v20, %v2109_v60  ;;  %v2667_v60 = vld [vmem:[#allocation2 + $0x5c] sm:$0xf] }
 0x407   :  { %3757 = vmatpush3.bf16.msra.mxu1 %v3756_v29  ;;  %v2112_v29 = vld [vmem:[#allocation3 + $0x218] sm:$0xff] }
 0x408   :  { %3758 = vmatprep.subr.bf16.mxu1 %v3973_v0  ;;  %v3810_v62 = vpack.c.bf16 %v2112_v29, %v2111_v28 }
 0x40a   :  { %3449 = vmatmul.mubr.msk.f32.vlgmr.msra.gmra.mrb[0].mxu1 %vm840_vm2, %v1387_v54  ;;  %v2191_v54 = vld [vmem:[#allocation3 + $0x230] sm:$0xff] }
 0x40b   :  { %3760 = vmatpush3.bf16.msra.mxu1 %v3759_v39  ;;  %3459 = vmatprep.mubr.msk.f32.mxu1 %vm3974_vm0, %v3975_v1  ;;  %v2189_v39 = vld [vmem:[#allocation3 + $0x220] sm:$0xff] }
 0x40c   :  { %3761 = vmatprep.subr.bf16.mxu1 %v3973_v0  ;;  %v3813_v38 = vpack.c.bf16 %v2190_v44, %v2189_v39 }
 0x40f   :  { %3763 = vmatpush3.bf16.msra.mxu1 %v3762_v42  ;;  %v2192_v42 = vld [vmem:[#allocation3 + $0x238] sm:$0xff] }
 0x410   :  { %3764 = vmatprep.subr.bf16.mxu1 %v3973_v0  ;;  %v3816_v50 = vpack.c.bf16 %v2192_v42, %v2191_v54 }
 0x412   :  { %3460 = vmatmul.mubr.msk.f32.vlgmr.msra.gmra.mrb[0].mxu1 %vm840_vm2, %v1467_v7  ;;  %v2271_v7 = vld [vmem:[#allocation3 + $0x250] sm:$0xff] }
 0x413   :  { %3766 = vmatpush3.bf16.msra.mxu1 %v3765_v3  ;;  %3470 = vmatprep.mubr.msk.f32.mxu1 %vm3974_vm0, %v3975_v1  ;;  %v2269_v3 = vld [vmem:[#allocation3 + $0x240] sm:$0xff] }
 0x414   :  { %3767 = vmatprep.subr.bf16.mxu1 %v3973_v0  ;;  %v3819_v6 = vpack.c.bf16 %v2270_v5, %v2269_v3 }
 0x417   :  { %3769 = vmatpush3.bf16.msra.mxu1 %v3768_v10  ;;  %v2272_v10 = vld [vmem:[#allocation3 + $0x258] sm:$0xff] }
 0x418   :  { %3770 = vmatprep.subr.bf16.mxu1 %v3973_v0  ;;  %v3822_v13 = vpack.c.bf16 %v2272_v10, %v2271_v7 }
 0x41a   :  { %3471 = vmatmul.mubr.msk.f32.vlgmr.msra.gmra.mrb[0].mxu1 %vm840_vm2, %v1547_v22  ;;  %v2351_v22 = vld [vmem:[#allocation3 + $0x270] sm:$0xff] }
 0x41b   :  { %3772 = vmatpush3.bf16.msra.mxu1 %v3771_v16  ;;  %3481 = vmatprep.mubr.msk.f32.mxu1 %vm3974_vm0, %v3975_v1  ;;  %v2349_v16 = vld [vmem:[#allocation3 + $0x260] sm:$0xff] }
 0x41c   :  { %3773 = vmatprep.subr.bf16.mxu1 %v3973_v0  ;;  %v3825_v18 = vpack.c.bf16 %v2350_v17, %v2349_v16 }
 0x41f   :  { %3775 = vmatpush3.bf16.msra.mxu1 %v3774_v23  ;;  %v2352_v23 = vld [vmem:[#allocation3 + $0x278] sm:$0xff] }
 0x420   :  { %3776 = vmatprep.subr.bf16.mxu1 %v3973_v0  ;;  %v3828_v26 = vpack.c.bf16 %v2352_v23, %v2351_v22 }
 0x422   :  { %3482 = vmatmul.mubr.msk.f32.vlgmr.msra.gmra.mrb[0].mxu1 %vm840_vm2, %v1627_v45  ;;  %v2431_v45 = vld [vmem:[#allocation3 + $0x290] sm:$0xff] }
 0x423   :  { %3778 = vmatpush3.bf16.msra.mxu1 %v3777_v30  ;;  %3492 = vmatprep.mubr.msk.f32.mxu1 %vm3974_vm0, %v3975_v1  ;;  %v2429_v30 = vld [vmem:[#allocation3 + $0x280] sm:$0xff] }
 0x424   :  { %3779 = vmatprep.subr.bf16.mxu1 %v3973_v0  ;;  %v3831_v19 = vpack.c.bf16 %v2430_v31, %v2429_v30 }
 0x427   :  { %3781 = vmatpush3.bf16.msra.mxu1 %v3780_v33  ;;  %v2432_v33 = vld [vmem:[#allocation3 + $0x298] sm:$0xff] }
 0x428   :  { %3782 = vmatprep.subr.bf16.mxu1 %v3973_v0  ;;  %v3834_v63 = vpack.c.bf16 %v2432_v33, %v2431_v45 }
 0x42a   :  { %3493 = vmatmul.mubr.msk.f32.vlgmr.msra.gmra.mrb[0].mxu1 %vm840_vm2, %v1707_v40  ;;  %v2511_v40 = vld [vmem:[#allocation3 + $0x2b0] sm:$0xff] }
 0x42b   :  { %3784 = vmatpush3.bf16.msra.mxu1 %v3783_v37  ;;  %3503 = vmatprep.mubr.msk.f32.mxu1 %vm3974_vm0, %v3975_v1  ;;  %v2509_v37 = vld [vmem:[#allocation3 + $0x2a0] sm:$0xff] }
 0x42c   :  { %3785 = vmatprep.subr.bf16.mxu1 %v3973_v0  ;;  %v3837_v24 = vpack.c.bf16 %v2510_v57, %v2509_v37 }
 0x42f   :  { %3787 = vmatpush3.bf16.msra.mxu1 %v3786_v34  ;;  %v2512_v34 = vld [vmem:[#allocation3 + $0x2b8] sm:$0xff] }
 0x430   :  { %3788 = vmatprep.subr.bf16.mxu1 %v3973_v0  ;;  %v3840_v2 = vpack.c.bf16 %v2512_v34, %v2511_v40 }
 0x432   :  { %3504 = vmatmul.mubr.msk.f32.vlgmr.msra.gmra.mrb[0].mxu1 %vm840_vm2, %v1787_v27  ;;  %v2591_v27 = vld [vmem:[#allocation3 + $0x2d0] sm:$0xff] }
 0x433   :  { %3790 = vmatpush3.bf16.msra.mxu1 %v3789_v43  ;;  %3514 = vmatprep.mubr.msk.f32.mxu1 %vm3974_vm0, %v3975_v1  ;;  %v2589_v43 = vld [vmem:[#allocation3 + $0x2c0] sm:$0xff] }
 0x434   :  { %3791 = vmatprep.subr.bf16.mxu1 %v3973_v0  ;;  %v3843_v15 = vpack.c.bf16 %v2590_v8, %v2589_v43 }
 0x437   :  { %3793 = vmatpush3.bf16.msra.mxu1 %v3792_v35  ;;  %v2592_v35 = vld [vmem:[#allocation3 + $0x2d8] sm:$0xff] }
 0x438   :  { %3794 = vmatprep.subr.bf16.mxu1 %v3973_v0  ;;  %v3846_v48 = vpack.c.bf16 %v2592_v35, %v2591_v27 }
 0x43a   :  { %3515 = vmatmul.mubr.msk.f32.vlgmr.msra.gmra.mrb[0].mxu1 %vm840_vm2, %v1867_v55  ;;  %v2671_v55 = vld [vmem:[#allocation3 + $0x2f0] sm:$0xff] }
 0x43b   :  { %3796 = vmatpush3.bf16.msra.mxu1 %v3795_v51  ;;  %3525 = vmatprep.mubr.msk.f32.mxu1 %vm3974_vm0, %v3975_v1  ;;  %v2669_v51 = vld [vmem:[#allocation3 + $0x2e0] sm:$0xff] }
 0x43c   :  { %3797 = vmatprep.subr.bf16.mxu1 %v3973_v0  ;;  %v3849_v53 = vpack.c.bf16 %v2670_v52, %v2669_v51 }
 0x43f   :  { %3799 = vmatpush3.bf16.msra.mxu1 %v3798_v56  ;;  %v2672_v56 = vld [vmem:[#allocation3 + $0x2f8] sm:$0xff] }
 0x440   :  { %3800 = vmatprep.subr.bf16.mxu1 %v3973_v0  ;;  %v3852_v14 = vpack.c.bf16 %v2672_v56, %v2671_v55 }
 0x442   :  { %3526 = vmatmul.mubr.msk.f32.vlgmr.msra.gmra.mrb[0].mxu1 %vm840_vm2, %v1947_v59  ;;  %v2751_v59 = vld [vmem:[#allocation3 + $0x310] sm:$0xff] }
 0x443   :  { %3802 = vmatpush3.bf16.msra.mxu1 %v3801_v49  ;;  %3536 = vmatprep.mubr.msk.f32.mxu1 %vm3974_vm0, %v3975_v1  ;;  %v2749_v49 = vld [vmem:[#allocation3 + $0x300] sm:$0xff] }
 0x444   :  { %3803 = vmatprep.subr.bf16.mxu1 %v3973_v0  ;;  %v3855_v4 = vpack.c.bf16 %v2750_v58, %v2749_v49 }
 0x447   :  { %3805 = vmatpush3.bf16.msra.mxu1 %v3804_v12  ;;  %v2752_v12 = vld [vmem:[#allocation3 + $0x318] sm:$0xff] }
 0x448   :  { %3806 = vmatprep.subr.bf16.mxu1 %v3973_v0  ;;  %v3858_v20 = vpack.c.bf16 %v2752_v12, %v2751_v59 }
 0x44a   :  { %3537 = vmatmul.mubr.msk.f32.vlgmr.msra.gmra.mrb[0].mxu1 %vm840_vm2, %v2027_v47 }
 0x44b   :  { %3808 = vmatpush3.bf16.msra.mxu1 %v3807_v61  ;;  %3547 = vmatprep.mubr.msk.f32.mxu1 %vm3974_vm0, %v3975_v1  ;;  %v2747_v61 = vld [vmem:[#allocation2 + $0x60] sm:$0xf] }
 0x44c   :  { %3809 = vmatprep.subr.bf16.mxu1 %v3973_v0 }
 0x44f   :  { %3811 = vmatpush3.bf16.msra.mxu1 %v3810_v62 }
 0x450   :  { %3812 = vmatprep.subr.bf16.mxu1 %v3973_v0 }
 0x452   :  { %3548 = vmatmul.mubr.msk.f32.vlgmr.msra.gmra.mrb[0].mxu1 %vm840_vm2, %v2107_v21 }
 0x453   :  { %3814 = vmatpush3.bf16.msra.mxu1 %v3813_v38  ;;  %3558 = vmatprep.mubr.msk.f32.mxu1 %vm3974_vm0, %v3975_v1 }
 0x454   :  { %3815 = vmatprep.subr.bf16.mxu1 %v3973_v0 }
 0x457   :  { %3817 = vmatpush3.bf16.msra.mxu1 %v3816_v50 }
 0x458   :  { %3818 = vmatprep.subr.bf16.mxu1 %v3973_v0 }
 0x45a   :  { %3559 = vmatmul.mubr.msk.f32.vlgmr.msra.gmra.mrb[0].mxu1 %vm840_vm2, %v2187_v11 }
 0x45b   :  { %3820 = vmatpush3.bf16.msra.mxu1 %v3819_v6  ;;  %3569 = vmatprep.mubr.msk.f32.mxu1 %vm3974_vm0, %v3975_v1 }
 0x45c   :  { %3821 = vmatprep.subr.bf16.mxu1 %v3973_v0 }
 0x45f   :  { %3823 = vmatpush3.bf16.msra.mxu1 %v3822_v13 }
 0x460   :  { %3824 = vmatprep.subr.bf16.mxu1 %v3973_v0 }
 0x462   :  { %3570 = vmatmul.mubr.msk.f32.vlgmr.msra.gmra.mrb[0].mxu1 %vm840_vm2, %v2267_v25 }
 0x463   :  { %3826 = vmatpush3.bf16.msra.mxu1 %v3825_v18  ;;  %3580 = vmatprep.mubr.msk.f32.mxu1 %vm3974_vm0, %v3975_v1 }
 0x464   :  { %3827 = vmatprep.subr.bf16.mxu1 %v3973_v0 }
 0x467   :  { %3829 = vmatpush3.bf16.msra.mxu1 %v3828_v26  ;;  %v2827_v26 = vld [vmem:[%s4655_s3 + $0x6] sm:$0x1] }
 0x468   :  { %3830 = vmatprep.subr.bf16.mxu1 %v3973_v0 }
 0x46a   :  { %3581 = vmatmul.mubr.msk.f32.vlgmr.msra.gmra.mrb[0].mxu1 %vm840_vm2, %v2347_v36 }
 0x46b   :  { %3832 = vmatpush3.bf16.msra.mxu1 %v3831_v19  ;;  %3591 = vmatprep.mubr.msk.f32.mxu1 %vm3974_vm0, %v3975_v1  ;;  %v2828_v19 = vld [vmem:[%s4655_s3 + $0x7] sm:$0x1] }
 0x46c   :  { %3833 = vmatprep.subr.bf16.mxu1 %v3973_v0 }
 0x46f   :  { %3835 = vmatpush3.bf16.msra.mxu1 %v3834_v63 }
 0x470   :  { %3836 = vmatprep.subr.bf16.mxu1 %v3973_v0 }
 0x472   :  { %3592 = vmatmul.mubr.msk.f32.vlgmr.msra.gmra.mrb[0].mxu1 %vm840_vm2, %v2427_v41 }
 0x473   :  { %3838 = vmatpush3.bf16.msra.mxu1 %v3837_v24  ;;  %3602 = vmatprep.mubr.msk.f32.mxu1 %vm3974_vm0, %v3975_v1 }
 0x474   :  { %3839 = vmatprep.subr.bf16.mxu1 %v3973_v0 }
 0x477   :  { %3841 = vmatpush3.bf16.msra.mxu1 %v3840_v2 }
 0x478   :  { %3842 = vmatprep.subr.bf16.mxu1 %v3973_v0 }
 0x47a   :  { %3603 = vmatmul.mubr.msk.f32.vlgmr.msra.gmra.mrb[0].mxu1 %vm840_vm2, %v2507_v46 }
 0x47b   :  { %3844 = vmatpush3.bf16.msra.mxu1 %v3843_v15  ;;  %3613 = vmatprep.mubr.msk.f32.mxu1 %vm3974_vm0, %v3975_v1 }
 0x47c   :  { %3845 = vmatprep.subr.bf16.mxu1 %v3973_v0 }
 0x47f   :  { %3847 = vmatpush3.bf16.msra.mxu1 %v3846_v48 }
 0x480   :  { %3848 = vmatprep.subr.bf16.mxu1 %v3973_v0 }
 0x482   :  { %3614 = vmatmul.mubr.msk.f32.vlgmr.msra.gmra.mrb[0].mxu1 %vm840_vm2, %v2587_v9 }
 0x483   :  { %3850 = vmatpush3.bf16.msra.mxu1 %v3849_v53  ;;  %3624 = vmatprep.mubr.msk.f32.mxu1 %vm3974_vm0, %v3975_v1 }
 0x484   :  { %3851 = vmatprep.subr.bf16.mxu1 %v3973_v0 }
 0x487   :  { %3853 = vmatpush3.bf16.msra.mxu1 %v3852_v14 }
 0x488   :  { %3854 = vmatprep.subr.bf16.mxu1 %v3973_v0 }
 0x48a   :  { %3625 = vmatmul.mubr.msk.f32.vlgmr.msra.gmra.mrb[0].mxu1 %vm840_vm2, %v2667_v60 }
 0x48b   :  { %3856 = vmatpush3.bf16.msra.mxu1 %v3855_v4  ;;  %3635 = vmatprep.mubr.msk.f32.mxu1 %vm3974_vm0, %v3975_v1 }
 0x48c   :  { %3857 = vmatprep.subr.bf16.mxu1 %v3973_v0 }
 0x48f   :  { %3859 = vmatpush3.bf16.msra.mxu1 %v3858_v20 }
 0x492   :  { %3636 = vmatmul.mubr.msk.f32.vlgmr.msra.gmra.mrb[0].mxu1 %vm840_vm2, %v2747_v61 }
 0x4ad   :  { %v910_v28 = vpop.f32.mrb[78].mxu0 }
 0x4ae   :  { %v3373_v29 = vpop.f32.mrb[79].mxu0 }
 0x565   :  { %v2822_v47 = vpop.f32.mrb[0].mxu1 }
 0x566   :  { %v3860_v62 = vadd.f32 %v2822_v47, %v910_v28  ;;  %v3637_v39 = vpop.f32.mrb[1].mxu1 }
 0x568   :  { %v2829_v44 = vsel %vm204_vm1, %v3860_v62, 0.0  ;;  %v2836_v38 = vmul.f32 %v3860_v62, %v3860_v62 }
 0x569   :  { %v2830_v54 = vrot.slane %v2829_v44, 4 }
 0x56a   :  { %v2837_v42 = vsel %vm204_vm1, %v2836_v38, 0.0 }
 0x56b   :  { %v2831_v21 = vadd.f32 %v2830_v54, %v2829_v44  ;;  %v2838_v50 = vrot.slane %v2837_v42, 4 }
 0x56d   :  { %v2832_v1 = vrot.slane %v2831_v21, 2  ;;  %v2839_v3 = vadd.f32 %v2838_v50, %v2837_v42 }
 0x56f   :  { %v2833_v0 = vadd.f32 %v2832_v1, %v2831_v21  ;;  %v2840_v5 = vrot.slane %v2839_v3, 2 }
 0x571   :  { %v2834_v6 = vrot.slane %v2833_v0, 1  ;;  %v2841_v7 = vadd.f32 %v2840_v5, %v2839_v3 }
 0x573   :  { %v2835_v10 = vadd.f32 %v2834_v6, %v2833_v0  ;;  %v2842_v11 = vrot.slane %v2841_v7, 1 }
 0x575   :  { %v2843_v13 = vadd.f32 %v2842_v11, %v2841_v7  ;;  %v2844_v16 = vmul.f32 0.25, %v2835_v10 }
 0x577   :  { %v2845_v17 = vmul.f32 0.25, %v2843_v13  ;;  %v2846_v18 = vmul.f32 %v2844_v16, %v2844_v16 }
 0x579   :  { %v2847_v22 = vsub.f32 %v2845_v17, %v2846_v18 }
 0x57b   :  { %v2848_v23 = vmax.f32 %v2847_v22, 0.0 }
 0x57d   :  { %v2849_v25 = vadd.f32 1e-05, %v2848_v23 }
 0x57f   :  { %3920 = vrsqrt.f32 %v2849_v25 }
 0x589   :  { %v3921_v30 = vpop.eup %3920 }
 0x58a   :  { %v2851_v31 = vmul.f32 %v3921_v30, %v2827_v26 }
 0x58c   :  { %v2857_v45 = vrot.slane %v2851_v31, %v4252_v32  ;;  %v2852_v33 = vmul.f32 %v2851_v31, %v2844_v16 }
 0x58e   :  { %v2853_v36 = vsub.f32 %v2828_v19, %v2852_v33  ;;  %v2858_v63 = vmul.f32 %v3860_v62, %v2857_v45 }
 0x590   :  { %v2862_v37 = vrot.slane %v2853_v36, %v4252_v32 }
 0x592   :  { %v2863_v57 = vadd.f32 %v2862_v37, %v2858_v63 }
 0x594   :  { %v2864_v24 = vmax.f32 %v2863_v57, 0.0 }
 0x596   :  { %2865 = vst [vmem:[#allocation6] sm:$0xf] %v2864_v24 }
 0x597   :  { %3955 = shalt.err (!%p3952_p12)
}
 0x598   :  { %s3956_s5 = scalar_lea.hbm %s4656_s4, 64 }
 0x599   :  { %p3957_p13 = scmp.ne.s32.totalorder %s4656_s4, %s3956_s5  ;;  %p3960_p0 = scmp.lt.u32.totalorder %s3956_s5, %s4656_s4 }
 0x59b   :  { %p3962_p1 = pnand %p3960_p0, %p3957_p13 }
 0x59d   :  { %3965 = shalt.err (!%p3962_p1)
}
 0x59e   :  { %2875 = dma.vmem_to_hbm [thread:$0]  %s2873_s29, 64, %s4656_s4, [#allocation5]  }
 0x59f   :  { %3968 = dma.done.wait [#allocation5], 64  }
 0x5a0   :  { %3969 = vsyncadd [#allocation5], 4294967232 }
 0x5a1   :  { %2879 = vsyncpa [#allocation4], 1 }
 0x5a2   :  { %2880 = vsyncpa [#allocation5], 1 }

</bundles_post_ra>
